<compile_context>
chip_gen: v6e
topology: v6e:2x2x1
jax: 0.10.0
libtpu: 0.0.40
codegen_flags: <defaults>
</compile_context>

<pallas_src>
import math
import functools

import numpy as np
import jax
import jax.numpy as jnp
from jax.experimental import pallas as pl
from jax.experimental.pallas import tpu as pltpu


# --------------------------------------------------------------------------- shared helpers
def _gelu(x):
    # exact same tanh approximation as the PyTorch `gelu`
    return 0.5 * x * (1.0 + jnp.tanh(math.sqrt(2.0 / math.pi) * (x + 0.044715 * x * x * x)))


def _pos_emb(klen, d):
    pos_seq = jnp.arange(klen - 1, -1, -1.0, dtype=jnp.float32)
    inv_freq = 1.0 / (10000.0 ** (jnp.arange(0.0, d, 2.0, dtype=jnp.float32) / d))
    sinusoid = jnp.outer(pos_seq, inv_freq)
    return jnp.concatenate([jnp.sin(sinusoid), jnp.cos(sinusoid)], axis=-1)


@functools.lru_cache(maxsize=None)
def _rel_shift_indices(B, H):
    """Static (b,h) source map reproducing MultiHeadAttention._rel_shift exactly.

    output (bo,ho):  n = B + bo*H + ho ; src_b = n // (H+1) ; h' = n % (H+1)
      h' == 0 -> zeros ; else BD[src_b, h'-1].
    Since BD[b,h] = Q_rr[b,h] @ r[h]^T the shift is applied to the matmul operands,
    so the un-shifted BD tensor is never materialized.
    """
    src_b = np.zeros((B, H), np.int32)
    src_h = np.zeros((B, H), np.int32)
    keep = np.zeros((B, H), np.bool_)
    for bo in range(B):
        for ho in range(H):
            n = B + bo * H + ho
            b, hp = divmod(n, H + 1)
            if hp > 0:
                src_b[bo, ho] = b
                src_h[bo, ho] = hp - 1
                keep[bo, ho] = True
    return src_b, src_h, keep


_DIMNUMS_T = (((1,), (1,)), ((), ()))  # contract last dims of both operands (A @ B^T)


# --------------------------------------------------------------------------- fused whole-model kernel
def _snli_model_kernel(h0_ref, pos_ref, wemb_ref, snliw_ref, snlib_ref,
                       rwb_ref, rrb_ref, wqkv_ref, bqkv_ref, rnet_ref,
                       ow_ref, ob_ref, ln1g_ref, ln1b_ref,
                       ff1w_ref, ff1b_ref, ff2w_ref, ff2b_ref,
                       ln2g_ref, ln2b_ref,
                       hids_ref, lm_ref, snli_ref, h_scr,
                       *, B, Q, H, dh, eps):
    HD = H * dh
    scale = 1.0 / math.sqrt(dh)
    layer = pl.program_id(0)

    # residual stream lives in VMEM scratch across the layer grid
    @pl.when(layer == 0)
    def _():
        h_scr[...] = h0_ref[...]

    x = h_scr[...]                                  # (B*Q, D) f32
    xb = x.astype(jnp.bfloat16)

    # ---- fused Q/K/V projection (single MXU matmul) + r_net ----
    qkv = jnp.dot(xb, wqkv_ref[0], preferred_element_type=jnp.float32) + bqkv_ref[0]
    r = jnp.dot(pos_ref[...], rnet_ref[0], preferred_element_type=jnp.float32)   # (K, HD)

    rwb = rwb_ref[0]                                # (1, HD) f32
    rrb = rrb_ref[0]
    ow = ow_ref[0]                                  # (HD, D) bf16

    src_b, src_h, keep = _rel_shift_indices(B, H)   # static host-side map

    # static lane / sublane slices into the fused qkv activation
    def q_sl(b, h):
        return qkv[b * Q:(b + 1) * Q, h * dh:(h + 1) * dh]

    def k_sl(b, h):
        return qkv[b * Q:(b + 1) * Q, HD + h * dh:HD + (h + 1) * dh]

    def v_sl(b, h):
        return qkv[b * Q:(b + 1) * Q, 2 * HD + h * dh:2 * HD + (h + 1) * dh]

    row = jax.lax.broadcasted_iota(jnp.int32, (Q, Q), 0)
    col = jax.lax.broadcasted_iota(jnp.int32, (Q, Q), 1)
    neg = jnp.float32(-1e9)

    attn_rows = []
    for b in range(B):
        o_b = None
        for h in range(H):
            q_rw = (q_sl(b, h) + rwb[:, h * dh:(h + 1) * dh]).astype(jnp.bfloat16)
            k_bh = k_sl(b, h).astype(jnp.bfloat16)
            s = jax.lax.dot_general(q_rw, k_bh, _DIMNUMS_T,
                                    preferred_element_type=jnp.float32)           # AC (Q,K)
            if bool(keep[b, h]):
                sb, sh = int(src_b[b, h]), int(src_h[b, h])
                q_rr = (q_sl(sb, sh) + rrb[:, sh * dh:(sh + 1) * dh]).astype(jnp.bfloat16)
                r_sh = r[:, sh * dh:(sh + 1) * dh].astype(jnp.bfloat16)
                s = s + jax.lax.dot_general(q_rr, r_sh, _DIMNUMS_T,
                                            preferred_element_type=jnp.float32)   # + BD (rel-shifted)
            s = s * scale
            s = jnp.where(col > row, neg, s)        # causal / non-target mask (mlen == 0)
            m = jnp.max(s, axis=-1, keepdims=True)
            p = jnp.exp(s - m)
            p = p / jnp.sum(p, axis=-1, keepdims=True)
            pv = jnp.dot(p.astype(jnp.bfloat16), v_sl(b, h).astype(jnp.bfloat16),
                         preferred_element_type=jnp.float32)                      # (Q, dh)
            # output projection folded in per head: sum_h pv_h @ W_O[h*dh:(h+1)*dh]
            contrib = jnp.dot(pv.astype(jnp.bfloat16), ow[h * dh:(h + 1) * dh, :],
                              preferred_element_type=jnp.float32)                 # (Q, D)
            o_b = contrib if o_b is None else o_b + contrib
        attn_rows.append(o_b)
    attn_out = jnp.concatenate(attn_rows, axis=0) + ob_ref[0]                     # (B*Q, D)

    def layer_norm(v, g, bvec):
        mu = jnp.mean(v, axis=-1, keepdims=True)
        var = jnp.mean(jnp.square(v - mu), axis=-1, keepdims=True)
        return (v - mu) * jax.lax.rsqrt(var + eps) * g + bvec

    # ---- residual + LN1 ----
    h1 = layer_norm(x + attn_out, ln1g_ref[0], ln1b_ref[0])

    # ---- position-wise FFN (Conv1d k=1 == linear over embedding dim) ----
    f = jnp.dot(h1.astype(jnp.bfloat16), ff1w_ref[0],
                preferred_element_type=jnp.float32) + ff1b_ref[0]
    f = _gelu(f)
    f2 = jnp.dot(f.astype(jnp.bfloat16), ff2w_ref[0],
                 preferred_element_type=jnp.float32) + ff2b_ref[0]

    # ---- residual + LN2 ----
    out = layer_norm(h1 + f2, ln2g_ref[0], ln2b_ref[0])                            # (B*Q, D)

    h_scr[...] = out
    hids_ref[0] = out                                                              # per-layer mems

    # ---- tied LM head + SNLI head, last layer only ----
    @pl.when(layer == pl.num_programs(0) - 1)
    def _():
        ob16 = out.astype(jnp.bfloat16)
        # projection_lm weight tied to word_emb: contract last dims (no HBM transpose)
        lm_ref[...] = jax.lax.dot_general(ob16, wemb_ref[...], _DIMNUMS_T,
                                          preferred_element_type=jnp.float32)      # (B*Q, V)
        pooled = jnp.concatenate(
            [jnp.max(out[b * Q:(b + 1) * Q, :], axis=0, keepdims=True) for b in range(B)],
            axis=0)                                                                # (B, D)
        snli_ref[...] = jnp.tanh(
            jnp.dot(pooled.astype(jnp.bfloat16), snliw_ref[...],
                    preferred_element_type=jnp.float32) + snlib_ref[...])


# --------------------------------------------------------------------------- Pallas forward (glue)
def snli_forward_pallas(prep, sentences, cfg):
    B, Q = sentences.shape
    D, H, dh = cfg["d_embed"], cfg["n_head"], cfg["d_head"]
    F, L = cfg["d_ff"], cfg["n_layer"]
    V, n_out = cfg["n_dec_vocab"], cfg["n_output"]
    HD = H * dh

    h0 = prep["word_emb"][sentences]                           # (B, Q, D) f32 embedding gather
    pos_emb = _pos_emb(Q, D).astype(jnp.bfloat16)              # (Q, D); mems empty -> klen == qlen
    # TODO(synk): the g-stream attention is computed then discarded in PyTorch
    # (DecoderLayer returns input_g unchanged); output_g is unused downstream -> skipped.

    kernel = functools.partial(_snli_model_kernel, B=B, Q=Q, H=H, dh=dh,
                               eps=cfg["layer_norm_epsilon"])

    def full2(a, b):
        return pl.BlockSpec((a, b), lambda l: (0, 0))

    def per_layer(a, b):
        return pl.BlockSpec((1, a, b), lambda l: (l, 0, 0))

    hids, lm, snli = pl.pallas_call(
        kernel,
        grid=(L,),
        in_specs=[
            full2(B * Q, D),          # h0
            full2(Q, D),              # pos_emb (bf16)
            full2(V, D),              # word_emb (bf16, tied LM head)
            full2(D, n_out),          # snli_w (bf16)
            full2(1, n_out),          # snli_b
            per_layer(1, HD),         # r_w_bias
            per_layer(1, HD),         # r_r_bias
            per_layer(D, 3 * HD),     # fused W_QKV
            per_layer(1, 3 * HD),     # fused b_QKV
            per_layer(D, HD),         # r_net weight (no bias)
            per_layer(HD, D),         # W_O
            per_layer(1, D),          # b_O
            per_layer(1, D),          # ln1 gamma
            per_layer(1, D),          # ln1 beta
            per_layer(D, F),          # ff1 weight
            per_layer(1, F),          # ff1 bias
            per_layer(F, D),          # ff2 weight
            per_layer(1, D),          # ff2 bias
            per_layer(1, D),          # ln2 gamma
            per_layer(1, D),          # ln2 beta
        ],
        out_specs=[
            pl.BlockSpec((1, B * Q, D), lambda l: (l, 0, 0)),  # per-layer hidden (mems)
            pl.BlockSpec((B * Q, V), lambda l: (0, 0)),        # lm logits (last step)
            pl.BlockSpec((B, n_out), lambda l: (0, 0)),        # snli logits (last step)
        ],
        out_shape=(
            jax.ShapeDtypeStruct((L, B * Q, D), jnp.float32),
            jax.ShapeDtypeStruct((B * Q, V), jnp.float32),
            jax.ShapeDtypeStruct((B, n_out), jnp.float32),
        ),
        scratch_shapes=[pltpu.VMEM((B * Q, D), jnp.float32)],
        compiler_params=pltpu.CompilerParams(dimension_semantics=("arbitrary",)),
    )(h0.reshape(B * Q, D), pos_emb, prep["word_emb_bf"], prep["snli_w"], prep["snli_b"],
      prep["r_w_bias"], prep["r_r_bias"], prep["wqkv_w"], prep["wqkv_b"], prep["rnet_w"],
      prep["o_w"], prep["o_b"], prep["ln1_g"], prep["ln1_b"],
      prep["ff1_w"], prep["ff1_b"], prep["ff2_w"], prep["ff2_b"],
      prep["ln2_g"], prep["ln2_b"])

    lm_logit = lm.reshape(B, Q, V)[:, :-1, :]
    new_mems = [h0] + [hids[i].reshape(B, Q, D) for i in range(L)]   # _update_mems == hids
    return lm_logit, snli, new_mems


# --------------------------------------------------------------------------- pure-JAX reference
def snli_forward_ref(prep, sentences, cfg):
    B, Q = sentences.shape
    D, H, dh = cfg["d_embed"], cfg["n_head"], cfg["d_head"]
    L = cfg["n_layer"]
    HD = H * dh
    eps = cfg["layer_norm_epsilon"]
    scale = 1.0 / math.sqrt(dh)
    bf = lambda a: a.astype(jnp.bfloat16)

    h0 = prep["word_emb"][sentences]
    pos_emb = _pos_emb(Q, D)
    x = h0.reshape(B * Q, D)
    hids = [h0]
    causal = jnp.arange(Q)[None, :] > jnp.arange(Q)[:, None]

    def layer_norm(v, g, b):
        mu = jnp.mean(v, axis=-1, keepdims=True)
        var = jnp.mean(jnp.square(v - mu), axis=-1, keepdims=True)
        return (v - mu) * jax.lax.rsqrt(var + eps) * g + b

    for l in range(L):
        qkv = jnp.dot(bf(x), prep["wqkv_w"][l], preferred_element_type=jnp.float32) + prep["wqkv_b"][l]
        q_s = qkv[:, :HD].reshape(B, Q, H, dh)
        k_s = qkv[:, HD:2 * HD].reshape(B, Q, H, dh)
        v_s = qkv[:, 2 * HD:].reshape(B, Q, H, dh)
        rwb = prep["r_w_bias"][l].reshape(H, dh)
        rrb = prep["r_r_bias"][l].reshape(H, dh)
        q_rw = jnp.transpose(q_s + rwb, (0, 2, 1, 3))
        q_rr = jnp.transpose(q_s + rrb, (0, 2, 1, 3))
        k_t = jnp.transpose(k_s, (0, 2, 1, 3))
        v_t = jnp.transpose(v_s, (0, 2, 1, 3))
        r = jnp.dot(bf(pos_emb), prep["rnet_w"][l], preferred_element_type=jnp.float32)
        r_t = jnp.transpose(r.reshape(Q, H, dh), (1, 0, 2))

        ac = jnp.einsum("bhqd,bhkd->bhqk", bf(q_rw), bf(k_t), preferred_element_type=jnp.float32)
        bd = jnp.einsum("bhqd,hkd->bhqk", bf(q_rr), bf(r_t), preferred_element_type=jnp.float32)
        # literal torch _rel_shift: pad head dim with zeros, reinterpret, drop, reinterpret
        zero = jnp.zeros((B, 1, Q, Q), jnp.float32)
        bd = jnp.concatenate([zero, bd], axis=1).reshape(B * (H + 1), Q, Q)[B:].reshape(B, H, Q, Q)

        s = (ac + bd) * scale
        s = jnp.where(causal[None, None], jnp.float32(-1e9), s)
        m = jnp.max(s, axis=-1, keepdims=True)
        p = jnp.exp(s - m)
        p = p / jnp.sum(p, axis=-1, keepdims=True)
        attn = jnp.einsum("bhqk,bhkd->bhqd", bf(p), bf(v_t), preferred_element_type=jnp.float32)
        attn_vec = jnp.transpose(attn, (0, 2, 1, 3)).reshape(B * Q, HD)
        a_out = jnp.dot(bf(attn_vec), prep["o_w"][l], preferred_element_type=jnp.float32) + prep["o_b"][l]

        h1 = layer_norm(x + a_out, prep["ln1_g"][l], prep["ln1_b"][l])
        f = _gelu(jnp.dot(bf(h1), prep["ff1_w"][l], preferred_element_type=jnp.float32) + prep["ff1_b"][l])
        f2 = jnp.dot(bf(f), prep["ff2_w"][l], preferred_element_type=jnp.float32) + prep["ff2_b"][l]
        x = layer_norm(h1 + f2, prep["ln2_g"][l], prep["ln2_b"][l])
        hids.append(x.reshape(B, Q, D))

    out = x.reshape(B, Q, D)
    lm = jax.lax.dot_general(bf(x), prep["word_emb_bf"], _DIMNUMS_T,
                             preferred_element_type=jnp.float32).reshape(B, Q, -1)
    pooled = jnp.max(out, axis=1)
    snli = jnp.tanh(jnp.dot(bf(pooled), prep["snli_w"], preferred_element_type=jnp.float32)
                    + prep["snli_b"])
    return lm[:, :-1, :], snli, hids


# --------------------------------------------------------------------------- params
def init_params(cfg, key):
    keys = iter(jax.random.split(key, 256))
    rnd = lambda shape, scale=0.02: scale * jax.random.normal(next(keys), shape, jnp.float32)
    D, H, dh, F = cfg["d_embed"], cfg["n_head"], cfg["d_head"], cfg["d_ff"]
    params = {
        "word_emb": rnd((cfg["n_dec_vocab"], D)),
        "mask_emb": rnd((1, 1, D)),
        "r_w_bias": rnd((cfg["n_layer"], H, dh)),
        "r_r_bias": rnd((cfg["n_layer"], H, dh)),
        "snli_w": rnd((D, cfg["n_output"])),
        "snli_b": rnd((cfg["n_output"],)),
        "layers": [],
    }
    for _ in range(cfg["n_layer"]):
        params["layers"].append({
            "attn": {
                "wqkv_w": rnd((D, 3 * H * dh)), "wqkv_b": rnd((3 * H * dh,)),   # [W_Q|W_K|W_V]
                "r_w": rnd((D, H * dh)),                                        # r_net, no bias
                "o_w": rnd((H * dh, D)), "o_b": rnd((D,)),
            },
            "ln1_g": jnp.ones((D,), jnp.float32), "ln1_b": jnp.zeros((D,), jnp.float32),
            "ff1_w": rnd((D, F)), "ff1_b": rnd((F,)),
            "ff2_w": rnd((F, D)), "ff2_b": rnd((D,)),
            "ln2_g": jnp.ones((D,), jnp.float32), "ln2_b": jnp.zeros((D,), jnp.float32),
        })
    return params


def prepare_params(params, cfg):
    """One-time preprocessing: stack per-layer weights and cast matmul weights to bf16
    (hoisted out of the forward pass per the perf review)."""
    L, H, dh = cfg["n_layer"], cfg["n_head"], cfg["d_head"]
    HD = H * dh
    lay = params["layers"]
    bf = lambda a: a.astype(jnp.bfloat16)
    row = lambda a: a.reshape(1, -1)
    return {
        "word_emb": params["word_emb"],                         # f32 for the embedding gather
        "word_emb_bf": bf(params["word_emb"]),                  # tied LM-head weight
        "snli_w": bf(params["snli_w"]),
        "snli_b": row(params["snli_b"]),
        "r_w_bias": params["r_w_bias"].reshape(L, 1, HD),
        "r_r_bias": params["r_r_bias"].reshape(L, 1, HD),
        "wqkv_w": bf(jnp.stack([lay[i]["attn"]["wqkv_w"] for i in range(L)])),
        "wqkv_b": jnp.stack([row(lay[i]["attn"]["wqkv_b"]) for i in range(L)]),
        "rnet_w": bf(jnp.stack([lay[i]["attn"]["r_w"] for i in range(L)])),
        "o_w": bf(jnp.stack([lay[i]["attn"]["o_w"] for i in range(L)])),
        "o_b": jnp.stack([row(lay[i]["attn"]["o_b"]) for i in range(L)]),
        "ln1_g": jnp.stack([row(lay[i]["ln1_g"]) for i in range(L)]),
        "ln1_b": jnp.stack([row(lay[i]["ln1_b"]) for i in range(L)]),
        "ff1_w": bf(jnp.stack([lay[i]["ff1_w"] for i in range(L)])),
        "ff1_b": jnp.stack([row(lay[i]["ff1_b"]) for i in range(L)]),
        "ff2_w": bf(jnp.stack([lay[i]["ff2_w"] for i in range(L)])),
        "ff2_b": jnp.stack([row(lay[i]["ff2_b"]) for i in range(L)]),
        "ln2_g": jnp.stack([row(lay[i]["ln2_g"]) for i in range(L)]),
        "ln2_b": jnp.stack([row(lay[i]["ln2_b"]) for i in range(L)]),
    }


# --------------------------------------------------------------------------- main
if __name__ == "__main__":
    cfg = dict(n_dec_vocab=64, d_embed=32, n_head=2, d_head=16, d_ff=64,
               n_layer=2, n_output=3, dropout=0.0, layer_norm_epsilon=1e-5)
    # TODO(synk): nn.Dropout layers are identity here (inference semantics).

    key = jax.random.PRNGKey(0)
    pkey, dkey = jax.random.split(key)
    params = init_params(cfg, pkey)
    prep = prepare_params(params, cfg)          # one-time weight stacking / bf16 cast
    sentences = jax.random.randint(dkey, (2, 8), 0, cfg["n_dec_vocab"], dtype=jnp.int32)

    pallas_fwd = jax.jit(functools.partial(snli_forward_pallas, cfg=cfg))
    ref_fwd = jax.jit(functools.partial(snli_forward_ref, cfg=cfg))

    lm_logit, snli_logit, new_mems = pallas_fwd(prep, sentences)
    jax.block_until_ready((lm_logit, snli_logit, new_mems))

    # pure-JAX reference (identical bf16-operand / f32-accumulate precision policy,
    # literal torch-style _rel_shift) for validation
    lm_ref, snli_ref, _ = ref_fwd(prep, sentences)
    np.testing.assert_allclose(np.asarray(lm_logit), np.asarray(lm_ref), rtol=2e-2, atol=2e-3)
    np.testing.assert_allclose(np.asarray(snli_logit), np.asarray(snli_ref), rtol=2e-2, atol=2e-3)

    assert lm_logit.shape == (2, 7, cfg["n_dec_vocab"])
    assert snli_logit.shape == (2, cfg["n_output"])
    assert len(new_mems) == cfg["n_layer"] + 1

    print("KERNEL_OK")
</pallas_src>

<mosaic_0001>
module attributes {stable_mosaic.version = 11 : i64} {
  func.func @_snli_model_kernel(%arg0: i32, %arg1: memref<16x32xf32, #tpu.memory_space<vmem>>, %arg2: memref<8x32xbf16, #tpu.memory_space<vmem>>, %arg3: memref<64x32xbf16, #tpu.memory_space<vmem>>, %arg4: memref<32x3xbf16, #tpu.memory_space<vmem>>, %arg5: memref<1x3xf32, #tpu.memory_space<vmem>>, %arg6: memref<1x1x32xf32, #tpu.memory_space<vmem>>, %arg7: memref<1x1x32xf32, #tpu.memory_space<vmem>>, %arg8: memref<1x32x96xbf16, #tpu.memory_space<vmem>>, %arg9: memref<1x1x96xf32, #tpu.memory_space<vmem>>, %arg10: memref<1x32x32xbf16, #tpu.memory_space<vmem>>, %arg11: memref<1x32x32xbf16, #tpu.memory_space<vmem>>, %arg12: memref<1x1x32xf32, #tpu.memory_space<vmem>>, %arg13: memref<1x1x32xf32, #tpu.memory_space<vmem>>, %arg14: memref<1x1x32xf32, #tpu.memory_space<vmem>>, %arg15: memref<1x32x64xbf16, #tpu.memory_space<vmem>>, %arg16: memref<1x1x64xf32, #tpu.memory_space<vmem>>, %arg17: memref<1x64x32xbf16, #tpu.memory_space<vmem>>, %arg18: memref<1x1x32xf32, #tpu.memory_space<vmem>>, %arg19: memref<1x1x32xf32, #tpu.memory_space<vmem>>, %arg20: memref<1x1x32xf32, #tpu.memory_space<vmem>>, %arg21: memref<1x16x32xf32, #tpu.memory_space<vmem>>, %arg22: memref<16x64xf32, #tpu.memory_space<vmem>>, %arg23: memref<2x3xf32, #tpu.memory_space<vmem>>, %arg24: memref<16x32xf32, #tpu.memory_space<vmem>>) attributes {dimension_semantics = [#tpu.dimension_semantics<arbitrary>], iteration_bounds = array<i64: 2>, scalar_prefetch = 0 : i64, scratch_operands = 1 : i64, tpu.core_type = #tpu.core_type<tc>, window_params = [{pipeline_mode = #tpu.pipeline_mode<synchronous>, transform_indices = @transform_0, window_bounds = array<i64: 16, 32>}, {pipeline_mode = #tpu.pipeline_mode<synchronous>, transform_indices = @transform_1, window_bounds = array<i64: 8, 32>}, {pipeline_mode = #tpu.pipeline_mode<synchronous>, transform_indices = @transform_2, window_bounds = array<i64: 64, 32>}, {pipeline_mode = #tpu.pipeline_mode<synchronous>, transform_indices = @transform_3, window_bounds = array<i64: 32, 3>}, {pipeline_mode = #tpu.pipeline_mode<synchronous>, transform_indices = @transform_4, window_bounds = array<i64: 1, 3>}, {transform_indices = @transform_5, window_bounds = array<i64: 1, 1, 32>}, {transform_indices = @transform_6, window_bounds = array<i64: 1, 1, 32>}, {transform_indices = @transform_7, window_bounds = array<i64: 1, 32, 96>}, {transform_indices = @transform_8, window_bounds = array<i64: 1, 1, 96>}, {transform_indices = @transform_9, window_bounds = array<i64: 1, 32, 32>}, {transform_indices = @transform_10, window_bounds = array<i64: 1, 32, 32>}, {transform_indices = @transform_11, window_bounds = array<i64: 1, 1, 32>}, {transform_indices = @transform_12, window_bounds = array<i64: 1, 1, 32>}, {transform_indices = @transform_13, window_bounds = array<i64: 1, 1, 32>}, {transform_indices = @transform_14, window_bounds = array<i64: 1, 32, 64>}, {transform_indices = @transform_15, window_bounds = array<i64: 1, 1, 64>}, {transform_indices = @transform_16, window_bounds = array<i64: 1, 64, 32>}, {transform_indices = @transform_17, window_bounds = array<i64: 1, 1, 32>}, {transform_indices = @transform_18, window_bounds = array<i64: 1, 1, 32>}, {transform_indices = @transform_19, window_bounds = array<i64: 1, 1, 32>}, {transform_indices = @transform_20, window_bounds = array<i64: 1, 16, 32>}, {pipeline_mode = #tpu.pipeline_mode<synchronous>, transform_indices = @transform_21, window_bounds = array<i64: 16, 64>}, {pipeline_mode = #tpu.pipeline_mode<synchronous>, transform_indices = @transform_22, window_bounds = array<i64: 2, 3>}]} {
    %c0_i32 = arith.constant 0 : i32
    %0 = arith.cmpi eq, %arg0, %c0_i32 : i32
    %1 = arith.extui %0 : i1 to i32
    %c0_i32_0 = arith.constant 0 : i32
    %2 = arith.cmpi ne, %1, %c0_i32_0 : i32
    scf.if %2 {
      %c0_103 = arith.constant 0 : index
      %c0_104 = arith.constant 0 : index
      %264 = vector.load %arg1[%c0_103, %c0_104] : memref<16x32xf32, #tpu.memory_space<vmem>>, vector<16x32xf32>
      %c0_105 = arith.constant 0 : index
      %c0_106 = arith.constant 0 : index
      %265 = vector.load %arg24[%c0_105, %c0_106] : memref<16x32xf32, #tpu.memory_space<vmem>>, vector<16x32xf32>
      tpu.vector_store %arg24[%c0_105, %c0_106], %264 {strides = array<i32>} : memref<16x32xf32, #tpu.memory_space<vmem>>, vector<16x32xf32>,
    } else {
    }
    %c0 = arith.constant 0 : index
    %c0_1 = arith.constant 0 : index
    %3 = vector.load %arg24[%c0, %c0_1] : memref<16x32xf32, #tpu.memory_space<vmem>>, vector<16x32xf32>
    %4 = arith.truncf %3 : vector<16x32xf32> to vector<16x32xbf16>
    %c0_2 = arith.constant 0 : index
    %c0_3 = arith.constant 0 : index
    %c0_4 = arith.constant 0 : index
    %5 = vector.load %arg8[%c0_2, %c0_3, %c0_4] : memref<1x32x96xbf16, #tpu.memory_space<vmem>>, vector<1x32x96xbf16>
    %6 = vector.shape_cast %5 : vector<1x32x96xbf16> to vector<32x96xbf16>
    %cst = arith.constant dense<0.000000e+00> : vector<16x96xf32>
    %7 = tpu.matmul %4, %6, %cst {dimension_numbers = #tpu.dot_dimension_numbers<[1], [0], [0], [1], [0, 0, 1, 1], [], []>} : vector<16x32xbf16>, vector<32x96xbf16>, vector<16x96xf32> -> vector<16x96xf32>
    %c0_5 = arith.constant 0 : index
    %c0_6 = arith.constant 0 : index
    %c0_7 = arith.constant 0 : index
    %8 = vector.load %arg9[%c0_5, %c0_6, %c0_7] : memref<1x1x96xf32, #tpu.memory_space<vmem>>, vector<1x1x96xf32>
    %9 = vector.shape_cast %8 : vector<1x1x96xf32> to vector<1x96xf32>
    %10 = vector.broadcast %9 : vector<1x96xf32> to vector<16x96xf32>
    %11 = arith.addf %7, %10 : vector<16x96xf32>
    %c0_8 = arith.constant 0 : index
    %c0_9 = arith.constant 0 : index
    %12 = vector.load %arg2[%c0_8, %c0_9] : memref<8x32xbf16, #tpu.memory_space<vmem>>, vector<8x32xbf16>
    %c0_10 = arith.constant 0 : index
    %c0_11 = arith.constant 0 : index
    %c0_12 = arith.constant 0 : index
    %13 = vector.load %arg10[%c0_10, %c0_11, %c0_12] : memref<1x32x32xbf16, #tpu.memory_space<vmem>>, vector<1x32x32xbf16>
    %14 = vector.shape_cast %13 : vector<1x32x32xbf16> to vector<32x32xbf16>
    %cst_13 = arith.constant dense<0.000000e+00> : vector<8x32xf32>
    %15 = tpu.matmul %12, %14, %cst_13 {dimension_numbers = #tpu.dot_dimension_numbers<[1], [0], [0], [1], [0, 0, 1, 1], [], []>} : vector<8x32xbf16>, vector<32x32xbf16>, vector<8x32xf32> -> vector<8x32xf32>
    %c0_14 = arith.constant 0 : index
    %c0_15 = arith.constant 0 : index
    %c0_16 = arith.constant 0 : index
    %16 = vector.load %arg6[%c0_14, %c0_15, %c0_16] : memref<1x1x32xf32, #tpu.memory_space<vmem>>, vector<1x1x32xf32>
    %17 = vector.shape_cast %16 : vector<1x1x32xf32> to vector<1x32xf32>
    %c0_17 = arith.constant 0 : index
    %c0_18 = arith.constant 0 : index
    %c0_19 = arith.constant 0 : index
    %18 = vector.load %arg7[%c0_17, %c0_18, %c0_19] : memref<1x1x32xf32, #tpu.memory_space<vmem>>, vector<1x1x32xf32>
    %19 = vector.shape_cast %18 : vector<1x1x32xf32> to vector<1x32xf32>
    %c0_20 = arith.constant 0 : index
    %c0_21 = arith.constant 0 : index
    %c0_22 = arith.constant 0 : index
    %20 = vector.load %arg11[%c0_20, %c0_21, %c0_22] : memref<1x32x32xbf16, #tpu.memory_space<vmem>>, vector<1x32x32xbf16>
    %21 = vector.shape_cast %20 : vector<1x32x32xbf16> to vector<32x32xbf16>
    %22 = tpu.iota {dimensions = array<i32: 0>} : vector<8x8xi32>
    %23 = tpu.iota {dimensions = array<i32: 1>} : vector<8x8xi32>
    %24 = vector.extract_strided_slice %11 {offsets = [0, 0], sizes = [8, 16], strides = [1, 1]} : vector<16x96xf32> to vector<8x16xf32>
    %25 = vector.extract_strided_slice %17 {offsets = [0, 0], sizes = [1, 16], strides = [1, 1]} : vector<1x32xf32> to vector<1x16xf32>
    %26 = vector.broadcast %25 : vector<1x16xf32> to vector<8x16xf32>
    %27 = arith.addf %24, %26 : vector<8x16xf32>
    %28 = arith.truncf %27 : vector<8x16xf32> to vector<8x16xbf16>
    %29 = vector.extract_strided_slice %11 {offsets = [0, 32], sizes = [8, 16], strides = [1, 1]} : vector<16x96xf32> to vector<8x16xf32>
    %30 = arith.truncf %29 : vector<8x16xf32> to vector<8x16xbf16>
    %cst_23 = arith.constant dense<0.000000e+00> : vector<8x8xf32>
    %31 = tpu.matmul %28, %30, %cst_23 {dimension_numbers = #tpu.dot_dimension_numbers<[1], [1], [0], [0], [0, 0, 1, 0], [], []>} : vector<8x16xbf16>, vector<8x16xbf16>, vector<8x8xf32> -> vector<8x8xf32>
    %32 = vector.extract_strided_slice %11 {offsets = [0, 16], sizes = [8, 16], strides = [1, 1]} : vector<16x96xf32> to vector<8x16xf32>
    %33 = vector.extract_strided_slice %19 {offsets = [0, 16], sizes = [1, 16], strides = [1, 1]} : vector<1x32xf32> to vector<1x16xf32>
    %34 = vector.broadcast %33 : vector<1x16xf32> to vector<8x16xf32>
    %35 = arith.addf %32, %34 : vector<8x16xf32>
    %36 = arith.truncf %35 : vector<8x16xf32> to vector<8x16xbf16>
    %37 = vector.extract_strided_slice %15 {offsets = [0, 16], sizes = [8, 16], strides = [1, 1]} : vector<8x32xf32> to vector<8x16xf32>
    %38 = arith.truncf %37 : vector<8x16xf32> to vector<8x16xbf16>
    %cst_24 = arith.constant dense<0.000000e+00> : vector<8x8xf32>
    %39 = tpu.matmul %36, %38, %cst_24 {dimension_numbers = #tpu.dot_dimension_numbers<[1], [1], [0], [0], [0, 0, 1, 0], [], []>} : vector<8x16xbf16>, vector<8x16xbf16>, vector<8x8xf32> -> vector<8x8xf32>
    %40 = arith.addf %31, %39 : vector<8x8xf32>
    %cst_25 = arith.constant 2.500000e-01 : f32
    %41 = vector.broadcast %cst_25 : f32 to vector<8x8xf32>
    %42 = arith.mulf %40, %41 : vector<8x8xf32>
    %43 = arith.cmpi sgt, %23, %22 : vector<8x8xi32>
    %cst_26 = arith.constant -1.000000e+09 : f32
    %44 = vector.broadcast %cst_26 : f32 to vector<8x8xf32>
    %45 = arith.select %43, %44, %42 : vector<8x8xi1>, vector<8x8xf32>
    %cst_27 = arith.constant dense<0xFF800000> : vector<8xf32>
    %46 = vector.multi_reduction <maximumf>, %45, %cst_27 [1] : vector<8x8xf32> to vector<8xf32>
    %47 = vector.shape_cast %46 : vector<8xf32> to vector<8x1xf32>
    %48 = vector.broadcast %47 : vector<8x1xf32> to vector<8x8xf32>
    %49 = arith.subf %45, %48 : vector<8x8xf32>
    %50 = math.exp %49 : vector<8x8xf32>
    %cst_28 = arith.constant dense<0.000000e+00> : vector<8xf32>
    %51 = vector.multi_reduction <add>, %50, %cst_28 [1] : vector<8x8xf32> to vector<8xf32>
    %52 = vector.shape_cast %51 : vector<8xf32> to vector<8x1xf32>
    %53 = vector.broadcast %52 : vector<8x1xf32> to vector<8x8xf32>
    %54 = arith.divf %50, %53 : vector<8x8xf32>
    %55 = arith.truncf %54 : vector<8x8xf32> to vector<8x8xbf16>
    %56 = vector.extract_strided_slice %11 {offsets = [0, 64], sizes = [8, 16], strides = [1, 1]} : vector<16x96xf32> to vector<8x16xf32>
    %57 = arith.truncf %56 : vector<8x16xf32> to vector<8x16xbf16>
    %cst_29 = arith.constant dense<0.000000e+00> : vector<8x16xf32>
    %58 = tpu.matmul %55, %57, %cst_29 {dimension_numbers = #tpu.dot_dimension_numbers<[1], [0], [0], [1], [0, 0, 1, 1], [], []>} : vector<8x8xbf16>, vector<8x16xbf16>, vector<8x16xf32> -> vector<8x16xf32>
    %59 = arith.truncf %58 : vector<8x16xf32> to vector<8x16xbf16>
    %60 = vector.extract_strided_slice %21 {offsets = [0, 0], sizes = [16, 32], strides = [1, 1]} : vector<32x32xbf16> to vector<16x32xbf16>
    %cst_30 = arith.constant dense<0.000000e+00> : vector<8x32xf32>
    %61 = tpu.matmul %59, %60, %cst_30 {dimension_numbers = #tpu.dot_dimension_numbers<[1], [0], [0], [1], [0, 0, 1, 1], [], []>} : vector<8x16xbf16>, vector<16x32xbf16>, vector<8x32xf32> -> vector<8x32xf32>
    %62 = vector.extract_strided_slice %11 {offsets = [0, 16], sizes = [8, 16], strides = [1, 1]} : vector<16x96xf32> to vector<8x16xf32>
    %63 = vector.extract_strided_slice %17 {offsets = [0, 16], sizes = [1, 16], strides = [1, 1]} : vector<1x32xf32> to vector<1x16xf32>
    %64 = vector.broadcast %63 : vector<1x16xf32> to vector<8x16xf32>
    %65 = arith.addf %62, %64 : vector<8x16xf32>
    %66 = arith.truncf %65 : vector<8x16xf32> to vector<8x16xbf16>
    %67 = vector.extract_strided_slice %11 {offsets = [0, 48], sizes = [8, 16], strides = [1, 1]} : vector<16x96xf32> to vector<8x16xf32>
    %68 = arith.truncf %67 : vector<8x16xf32> to vector<8x16xbf16>
    %cst_31 = arith.constant dense<0.000000e+00> : vector<8x8xf32>
    %69 = tpu.matmul %66, %68, %cst_31 {dimension_numbers = #tpu.dot_dimension_numbers<[1], [1], [0], [0], [0, 0, 1, 0], [], []>} : vector<8x16xbf16>, vector<8x16xbf16>, vector<8x8xf32> -> vector<8x8xf32>
    %cst_32 = arith.constant 2.500000e-01 : f32
    %70 = vector.broadcast %cst_32 : f32 to vector<8x8xf32>
    %71 = arith.mulf %69, %70 : vector<8x8xf32>
    %72 = arith.cmpi sgt, %23, %22 : vector<8x8xi32>
    %cst_33 = arith.constant -1.000000e+09 : f32
    %73 = vector.broadcast %cst_33 : f32 to vector<8x8xf32>
    %74 = arith.select %72, %73, %71 : vector<8x8xi1>, vector<8x8xf32>
    %cst_34 = arith.constant dense<0xFF800000> : vector<8xf32>
    %75 = vector.multi_reduction <maximumf>, %74, %cst_34 [1] : vector<8x8xf32> to vector<8xf32>
    %76 = vector.shape_cast %75 : vector<8xf32> to vector<8x1xf32>
    %77 = vector.broadcast %76 : vector<8x1xf32> to vector<8x8xf32>
    %78 = arith.subf %74, %77 : vector<8x8xf32>
    %79 = math.exp %78 : vector<8x8xf32>
    %cst_35 = arith.constant dense<0.000000e+00> : vector<8xf32>
    %80 = vector.multi_reduction <add>, %79, %cst_35 [1] : vector<8x8xf32> to vector<8xf32>
    %81 = vector.shape_cast %80 : vector<8xf32> to vector<8x1xf32>
    %82 = vector.broadcast %81 : vector<8x1xf32> to vector<8x8xf32>
    %83 = arith.divf %79, %82 : vector<8x8xf32>
    %84 = arith.truncf %83 : vector<8x8xf32> to vector<8x8xbf16>
    %85 = vector.extract_strided_slice %11 {offsets = [0, 80], sizes = [8, 16], strides = [1, 1]} : vector<16x96xf32> to vector<8x16xf32>
    %86 = arith.truncf %85 : vector<8x16xf32> to vector<8x16xbf16>
    %cst_36 = arith.constant dense<0.000000e+00> : vector<8x16xf32>
    %87 = tpu.matmul %84, %86, %cst_36 {dimension_numbers = #tpu.dot_dimension_numbers<[1], [0], [0], [1], [0, 0, 1, 1], [], []>} : vector<8x8xbf16>, vector<8x16xbf16>, vector<8x16xf32> -> vector<8x16xf32>
    %88 = arith.truncf %87 : vector<8x16xf32> to vector<8x16xbf16>
    %89 = vector.extract_strided_slice %21 {offsets = [16, 0], sizes = [16, 32], strides = [1, 1]} : vector<32x32xbf16> to vector<16x32xbf16>
    %cst_37 = arith.constant dense<0.000000e+00> : vector<8x32xf32>
    %90 = tpu.matmul %88, %89, %cst_37 {dimension_numbers = #tpu.dot_dimension_numbers<[1], [0], [0], [1], [0, 0, 1, 1], [], []>} : vector<8x16xbf16>, vector<16x32xbf16>, vector<8x32xf32> -> vector<8x32xf32>
    %91 = arith.addf %61, %90 : vector<8x32xf32>
    %92 = vector.extract_strided_slice %11 {offsets = [8, 0], sizes = [8, 16], strides = [1, 1]} : vector<16x96xf32> to vector<8x16xf32>
    %93 = vector.extract_strided_slice %17 {offsets = [0, 0], sizes = [1, 16], strides = [1, 1]} : vector<1x32xf32> to vector<1x16xf32>
    %94 = vector.broadcast %93 : vector<1x16xf32> to vector<8x16xf32>
    %95 = arith.addf %92, %94 : vector<8x16xf32>
    %96 = arith.truncf %95 : vector<8x16xf32> to vector<8x16xbf16>
    %97 = vector.extract_strided_slice %11 {offsets = [8, 32], sizes = [8, 16], strides = [1, 1]} : vector<16x96xf32> to vector<8x16xf32>
    %98 = arith.truncf %97 : vector<8x16xf32> to vector<8x16xbf16>
    %cst_38 = arith.constant dense<0.000000e+00> : vector<8x8xf32>
    %99 = tpu.matmul %96, %98, %cst_38 {dimension_numbers = #tpu.dot_dimension_numbers<[1], [1], [0], [0], [0, 0, 1, 0], [], []>} : vector<8x16xbf16>, vector<8x16xbf16>, vector<8x8xf32> -> vector<8x8xf32>
    %100 = vector.extract_strided_slice %11 {offsets = [8, 0], sizes = [8, 16], strides = [1, 1]} : vector<16x96xf32> to vector<8x16xf32>
    %101 = vector.extract_strided_slice %19 {offsets = [0, 0], sizes = [1, 16], strides = [1, 1]} : vector<1x32xf32> to vector<1x16xf32>
    %102 = vector.broadcast %101 : vector<1x16xf32> to vector<8x16xf32>
    %103 = arith.addf %100, %102 : vector<8x16xf32>
    %104 = arith.truncf %103 : vector<8x16xf32> to vector<8x16xbf16>
    %105 = vector.extract_strided_slice %15 {offsets = [0, 0], sizes = [8, 16], strides = [1, 1]} : vector<8x32xf32> to vector<8x16xf32>
    %106 = arith.truncf %105 : vector<8x16xf32> to vector<8x16xbf16>
    %cst_39 = arith.constant dense<0.000000e+00> : vector<8x8xf32>
    %107 = tpu.matmul %104, %106, %cst_39 {dimension_numbers = #tpu.dot_dimension_numbers<[1], [1], [0], [0], [0, 0, 1, 0], [], []>} : vector<8x16xbf16>, vector<8x16xbf16>, vector<8x8xf32> -> vector<8x8xf32>
    %108 = arith.addf %99, %107 : vector<8x8xf32>
    %cst_40 = arith.constant 2.500000e-01 : f32
    %109 = vector.broadcast %cst_40 : f32 to vector<8x8xf32>
    %110 = arith.mulf %108, %109 : vector<8x8xf32>
    %111 = arith.cmpi sgt, %23, %22 : vector<8x8xi32>
    %cst_41 = arith.constant -1.000000e+09 : f32
    %112 = vector.broadcast %cst_41 : f32 to vector<8x8xf32>
    %113 = arith.select %111, %112, %110 : vector<8x8xi1>, vector<8x8xf32>
    %cst_42 = arith.constant dense<0xFF800000> : vector<8xf32>
    %114 = vector.multi_reduction <maximumf>, %113, %cst_42 [1] : vector<8x8xf32> to vector<8xf32>
    %115 = vector.shape_cast %114 : vector<8xf32> to vector<8x1xf32>
    %116 = vector.broadcast %115 : vector<8x1xf32> to vector<8x8xf32>
    %117 = arith.subf %113, %116 : vector<8x8xf32>
    %118 = math.exp %117 : vector<8x8xf32>
    %cst_43 = arith.constant dense<0.000000e+00> : vector<8xf32>
    %119 = vector.multi_reduction <add>, %118, %cst_43 [1] : vector<8x8xf32> to vector<8xf32>
    %120 = vector.shape_cast %119 : vector<8xf32> to vector<8x1xf32>
    %121 = vector.broadcast %120 : vector<8x1xf32> to vector<8x8xf32>
    %122 = arith.divf %118, %121 : vector<8x8xf32>
    %123 = arith.truncf %122 : vector<8x8xf32> to vector<8x8xbf16>
    %124 = vector.extract_strided_slice %11 {offsets = [8, 64], sizes = [8, 16], strides = [1, 1]} : vector<16x96xf32> to vector<8x16xf32>
    %125 = arith.truncf %124 : vector<8x16xf32> to vector<8x16xbf16>
    %cst_44 = arith.constant dense<0.000000e+00> : vector<8x16xf32>
    %126 = tpu.matmul %123, %125, %cst_44 {dimension_numbers = #tpu.dot_dimension_numbers<[1], [0], [0], [1], [0, 0, 1, 1], [], []>} : vector<8x8xbf16>, vector<8x16xbf16>, vector<8x16xf32> -> vector<8x16xf32>
    %127 = arith.truncf %126 : vector<8x16xf32> to vector<8x16xbf16>
    %128 = vector.extract_strided_slice %21 {offsets = [0, 0], sizes = [16, 32], strides = [1, 1]} : vector<32x32xbf16> to vector<16x32xbf16>
    %cst_45 = arith.constant dense<0.000000e+00> : vector<8x32xf32>
    %129 = tpu.matmul %127, %128, %cst_45 {dimension_numbers = #tpu.dot_dimension_numbers<[1], [0], [0], [1], [0, 0, 1, 1], [], []>} : vector<8x16xbf16>, vector<16x32xbf16>, vector<8x32xf32> -> vector<8x32xf32>
    %130 = vector.extract_strided_slice %11 {offsets = [8, 16], sizes = [8, 16], strides = [1, 1]} : vector<16x96xf32> to vector<8x16xf32>
    %131 = vector.extract_strided_slice %17 {offsets = [0, 16], sizes = [1, 16], strides = [1, 1]} : vector<1x32xf32> to vector<1x16xf32>
    %132 = vector.broadcast %131 : vector<1x16xf32> to vector<8x16xf32>
    %133 = arith.addf %130, %132 : vector<8x16xf32>
    %134 = arith.truncf %133 : vector<8x16xf32> to vector<8x16xbf16>
    %135 = vector.extract_strided_slice %11 {offsets = [8, 48], sizes = [8, 16], strides = [1, 1]} : vector<16x96xf32> to vector<8x16xf32>
    %136 = arith.truncf %135 : vector<8x16xf32> to vector<8x16xbf16>
    %cst_46 = arith.constant dense<0.000000e+00> : vector<8x8xf32>
    %137 = tpu.matmul %134, %136, %cst_46 {dimension_numbers = #tpu.dot_dimension_numbers<[1], [1], [0], [0], [0, 0, 1, 0], [], []>} : vector<8x16xbf16>, vector<8x16xbf16>, vector<8x8xf32> -> vector<8x8xf32>
    %138 = vector.extract_strided_slice %11 {offsets = [8, 16], sizes = [8, 16], strides = [1, 1]} : vector<16x96xf32> to vector<8x16xf32>
    %139 = vector.extract_strided_slice %19 {offsets = [0, 16], sizes = [1, 16], strides = [1, 1]} : vector<1x32xf32> to vector<1x16xf32>
    %140 = vector.broadcast %139 : vector<1x16xf32> to vector<8x16xf32>
    %141 = arith.addf %138, %140 : vector<8x16xf32>
    %142 = arith.truncf %141 : vector<8x16xf32> to vector<8x16xbf16>
    %143 = vector.extract_strided_slice %15 {offsets = [0, 16], sizes = [8, 16], strides = [1, 1]} : vector<8x32xf32> to vector<8x16xf32>
    %144 = arith.truncf %143 : vector<8x16xf32> to vector<8x16xbf16>
    %cst_47 = arith.constant dense<0.000000e+00> : vector<8x8xf32>
    %145 = tpu.matmul %142, %144, %cst_47 {dimension_numbers = #tpu.dot_dimension_numbers<[1], [1], [0], [0], [0, 0, 1, 0], [], []>} : vector<8x16xbf16>, vector<8x16xbf16>, vector<8x8xf32> -> vector<8x8xf32>
    %146 = arith.addf %137, %145 : vector<8x8xf32>
    %cst_48 = arith.constant 2.500000e-01 : f32
    %147 = vector.broadcast %cst_48 : f32 to vector<8x8xf32>
    %148 = arith.mulf %146, %147 : vector<8x8xf32>
    %149 = arith.cmpi sgt, %23, %22 : vector<8x8xi32>
    %cst_49 = arith.constant -1.000000e+09 : f32
    %150 = vector.broadcast %cst_49 : f32 to vector<8x8xf32>
    %151 = arith.select %149, %150, %148 : vector<8x8xi1>, vector<8x8xf32>
    %cst_50 = arith.constant dense<0xFF800000> : vector<8xf32>
    %152 = vector.multi_reduction <maximumf>, %151, %cst_50 [1] : vector<8x8xf32> to vector<8xf32>
    %153 = vector.shape_cast %152 : vector<8xf32> to vector<8x1xf32>
    %154 = vector.broadcast %153 : vector<8x1xf32> to vector<8x8xf32>
    %155 = arith.subf %151, %154 : vector<8x8xf32>
    %156 = math.exp %155 : vector<8x8xf32>
    %cst_51 = arith.constant dense<0.000000e+00> : vector<8xf32>
    %157 = vector.multi_reduction <add>, %156, %cst_51 [1] : vector<8x8xf32> to vector<8xf32>
    %158 = vector.shape_cast %157 : vector<8xf32> to vector<8x1xf32>
    %159 = vector.broadcast %158 : vector<8x1xf32> to vector<8x8xf32>
    %160 = arith.divf %156, %159 : vector<8x8xf32>
    %161 = arith.truncf %160 : vector<8x8xf32> to vector<8x8xbf16>
    %162 = vector.extract_strided_slice %11 {offsets = [8, 80], sizes = [8, 16], strides = [1, 1]} : vector<16x96xf32> to vector<8x16xf32>
    %163 = arith.truncf %162 : vector<8x16xf32> to vector<8x16xbf16>
    %cst_52 = arith.constant dense<0.000000e+00> : vector<8x16xf32>
    %164 = tpu.matmul %161, %163, %cst_52 {dimension_numbers = #tpu.dot_dimension_numbers<[1], [0], [0], [1], [0, 0, 1, 1], [], []>} : vector<8x8xbf16>, vector<8x16xbf16>, vector<8x16xf32> -> vector<8x16xf32>
    %165 = arith.truncf %164 : vector<8x16xf32> to vector<8x16xbf16>
    %166 = vector.extract_strided_slice %21 {offsets = [16, 0], sizes = [16, 32], strides = [1, 1]} : vector<32x32xbf16> to vector<16x32xbf16>
    %cst_53 = arith.constant dense<0.000000e+00> : vector<8x32xf32>
    %167 = tpu.matmul %165, %166, %cst_53 {dimension_numbers = #tpu.dot_dimension_numbers<[1], [0], [0], [1], [0, 0, 1, 1], [], []>} : vector<8x16xbf16>, vector<16x32xbf16>, vector<8x32xf32> -> vector<8x32xf32>
    %168 = arith.addf %129, %167 : vector<8x32xf32>
    %169 = tpu.concatenate %91, %168 in 0 : vector<8x32xf32>, vector<8x32xf32> -> vector<16x32xf32>
    %c0_54 = arith.constant 0 : index
    %c0_55 = arith.constant 0 : index
    %c0_56 = arith.constant 0 : index
    %170 = vector.load %arg12[%c0_54, %c0_55, %c0_56] : memref<1x1x32xf32, #tpu.memory_space<vmem>>, vector<1x1x32xf32>
    %171 = vector.shape_cast %170 : vector<1x1x32xf32> to vector<1x32xf32>
    %172 = vector.broadcast %171 : vector<1x32xf32> to vector<16x32xf32>
    %173 = arith.addf %169, %172 : vector<16x32xf32>
    %174 = arith.addf %3, %173 : vector<16x32xf32>
    %c0_57 = arith.constant 0 : index
    %c0_58 = arith.constant 0 : index
    %c0_59 = arith.constant 0 : index
    %175 = vector.load %arg13[%c0_57, %c0_58, %c0_59] : memref<1x1x32xf32, #tpu.memory_space<vmem>>, vector<1x1x32xf32>
    %176 = vector.shape_cast %175 : vector<1x1x32xf32> to vector<1x32xf32>
    %c0_60 = arith.constant 0 : index
    %c0_61 = arith.constant 0 : index
    %c0_62 = arith.constant 0 : index
    %177 = vector.load %arg14[%c0_60, %c0_61, %c0_62] : memref<1x1x32xf32, #tpu.memory_space<vmem>>, vector<1x1x32xf32>
    %178 = vector.shape_cast %177 : vector<1x1x32xf32> to vector<1x32xf32>
    %cst_63 = arith.constant dense<0.000000e+00> : vector<16xf32>
    %179 = vector.multi_reduction <add>, %174, %cst_63 [1] : vector<16x32xf32> to vector<16xf32>
    %180 = vector.shape_cast %179 : vector<16xf32> to vector<16x1xf32>
    %cst_64 = arith.constant 3.200000e+01 : f32
    %181 = vector.broadcast %cst_64 : f32 to vector<16x1xf32>
    %182 = arith.divf %180, %181 : vector<16x1xf32>
    %183 = vector.broadcast %182 : vector<16x1xf32> to vector<16x32xf32>
    %184 = arith.subf %174, %183 : vector<16x32xf32>
    %185 = arith.mulf %184, %184 : vector<16x32xf32>
    %cst_65 = arith.constant dense<0.000000e+00> : vector<16xf32>
    %186 = vector.multi_reduction <add>, %185, %cst_65 [1] : vector<16x32xf32> to vector<16xf32>
    %187 = vector.shape_cast %186 : vector<16xf32> to vector<16x1xf32>
    %cst_66 = arith.constant 3.200000e+01 : f32
    %188 = vector.broadcast %cst_66 : f32 to vector<16x1xf32>
    %189 = arith.divf %187, %188 : vector<16x1xf32>
    %190 = vector.broadcast %182 : vector<16x1xf32> to vector<16x32xf32>
    %191 = arith.subf %174, %190 : vector<16x32xf32>
    %cst_67 = arith.constant 9.99999974E-6 : f32
    %192 = vector.broadcast %cst_67 : f32 to vector<16x1xf32>
    %193 = arith.addf %189, %192 : vector<16x1xf32>
    %194 = math.rsqrt %193 : vector<16x1xf32>
    %195 = vector.broadcast %194 : vector<16x1xf32> to vector<16x32xf32>
    %196 = arith.mulf %191, %195 : vector<16x32xf32>
    %197 = vector.broadcast %176 : vector<1x32xf32> to vector<16x32xf32>
    %198 = arith.mulf %196, %197 : vector<16x32xf32>
    %199 = vector.broadcast %178 : vector<1x32xf32> to vector<16x32xf32>
    %200 = arith.addf %198, %199 : vector<16x32xf32>
    %201 = arith.truncf %200 : vector<16x32xf32> to vector<16x32xbf16>
    %c0_68 = arith.constant 0 : index
    %c0_69 = arith.constant 0 : index
    %c0_70 = arith.constant 0 : index
    %202 = vector.load %arg15[%c0_68, %c0_69, %c0_70] : memref<1x32x64xbf16, #tpu.memory_space<vmem>>, vector<1x32x64xbf16>
    %203 = vector.shape_cast %202 : vector<1x32x64xbf16> to vector<32x64xbf16>
    %cst_71 = arith.constant dense<0.000000e+00> : vector<16x64xf32>
    %204 = tpu.matmul %201, %203, %cst_71 {dimension_numbers = #tpu.dot_dimension_numbers<[1], [0], [0], [1], [0, 0, 1, 1], [], []>} : vector<16x32xbf16>, vector<32x64xbf16>, vector<16x64xf32> -> vector<16x64xf32>
    %c0_72 = arith.constant 0 : index
    %c0_73 = arith.constant 0 : index
    %c0_74 = arith.constant 0 : index
    %205 = vector.load %arg16[%c0_72, %c0_73, %c0_74] : memref<1x1x64xf32, #tpu.memory_space<vmem>>, vector<1x1x64xf32>
    %206 = vector.shape_cast %205 : vector<1x1x64xf32> to vector<1x64xf32>
    %207 = vector.broadcast %206 : vector<1x64xf32> to vector<16x64xf32>
    %208 = arith.addf %204, %207 : vector<16x64xf32>
    %cst_75 = arith.constant 5.000000e-01 : f32
    %209 = vector.broadcast %cst_75 : f32 to vector<16x64xf32>
    %210 = arith.mulf %209, %208 : vector<16x64xf32>
    %cst_76 = arith.constant 4.471500e-02 : f32
    %211 = vector.broadcast %cst_76 : f32 to vector<16x64xf32>
    %212 = arith.mulf %211, %208 : vector<16x64xf32>
    %213 = arith.mulf %212, %208 : vector<16x64xf32>
    %214 = arith.mulf %213, %208 : vector<16x64xf32>
    %215 = arith.addf %208, %214 : vector<16x64xf32>
    %cst_77 = arith.constant 0.797884583 : f32
    %216 = vector.broadcast %cst_77 : f32 to vector<16x64xf32>
    %217 = arith.mulf %216, %215 : vector<16x64xf32>
    %218 = math.tanh %217 : vector<16x64xf32>
    %cst_78 = arith.constant 1.000000e+00 : f32
    %219 = vector.broadcast %cst_78 : f32 to vector<16x64xf32>
    %220 = arith.addf %219, %218 : vector<16x64xf32>
    %221 = arith.mulf %210, %220 : vector<16x64xf32>
    %222 = arith.truncf %221 : vector<16x64xf32> to vector<16x64xbf16>
    %c0_79 = arith.constant 0 : index
    %c0_80 = arith.constant 0 : index
    %c0_81 = arith.constant 0 : index
    %223 = vector.load %arg17[%c0_79, %c0_80, %c0_81] : memref<1x64x32xbf16, #tpu.memory_space<vmem>>, vector<1x64x32xbf16>
    %224 = vector.shape_cast %223 : vector<1x64x32xbf16> to vector<64x32xbf16>
    %cst_82 = arith.constant dense<0.000000e+00> : vector<16x32xf32>
    %225 = tpu.matmul %222, %224, %cst_82 {dimension_numbers = #tpu.dot_dimension_numbers<[1], [0], [0], [1], [0, 0, 1, 1], [], []>} : vector<16x64xbf16>, vector<64x32xbf16>, vector<16x32xf32> -> vector<16x32xf32>
    %c0_83 = arith.constant 0 : index
    %c0_84 = arith.constant 0 : index
    %c0_85 = arith.constant 0 : index
    %226 = vector.load %arg18[%c0_83, %c0_84, %c0_85] : memref<1x1x32xf32, #tpu.memory_space<vmem>>, vector<1x1x32xf32>
    %227 = vector.shape_cast %226 : vector<1x1x32xf32> to vector<1x32xf32>
    %228 = vector.broadcast %227 : vector<1x32xf32> to vector<16x32xf32>
    %229 = arith.addf %225, %228 : vector<16x32xf32>
    %230 = arith.addf %200, %229 : vector<16x32xf32>
    %c0_86 = arith.constant 0 : index
    %c0_87 = arith.constant 0 : index
    %c0_88 = arith.constant 0 : index
    %231 = vector.load %arg19[%c0_86, %c0_87, %c0_88] : memref<1x1x32xf32, #tpu.memory_space<vmem>>, vector<1x1x32xf32>
    %232 = vector.shape_cast %231 : vector<1x1x32xf32> to vector<1x32xf32>
    %c0_89 = arith.constant 0 : index
    %c0_90 = arith.constant 0 : index
    %c0_91 = arith.constant 0 : index
    %233 = vector.load %arg20[%c0_89, %c0_90, %c0_91] : memref<1x1x32xf32, #tpu.memory_space<vmem>>, vector<1x1x32xf32>
    %234 = vector.shape_cast %233 : vector<1x1x32xf32> to vector<1x32xf32>
    %cst_92 = arith.constant dense<0.000000e+00> : vector<16xf32>
    %235 = vector.multi_reduction <add>, %230, %cst_92 [1] : vector<16x32xf32> to vector<16xf32>
    %236 = vector.shape_cast %235 : vector<16xf32> to vector<16x1xf32>
    %cst_93 = arith.constant 3.200000e+01 : f32
    %237 = vector.broadcast %cst_93 : f32 to vector<16x1xf32>
    %238 = arith.divf %236, %237 : vector<16x1xf32>
    %239 = vector.broadcast %238 : vector<16x1xf32> to vector<16x32xf32>
    %240 = arith.subf %230, %239 : vector<16x32xf32>
    %241 = arith.mulf %240, %240 : vector<16x32xf32>
    %cst_94 = arith.constant dense<0.000000e+00> : vector<16xf32>
    %242 = vector.multi_reduction <add>, %241, %cst_94 [1] : vector<16x32xf32> to vector<16xf32>
    %243 = vector.shape_cast %242 : vector<16xf32> to vector<16x1xf32>
    %cst_95 = arith.constant 3.200000e+01 : f32
    %244 = vector.broadcast %cst_95 : f32 to vector<16x1xf32>
    %245 = arith.divf %243, %244 : vector<16x1xf32>
    %246 = vector.broadcast %238 : vector<16x1xf32> to vector<16x32xf32>
    %247 = arith.subf %230, %246 : vector<16x32xf32>
    %cst_96 = arith.constant 9.99999974E-6 : f32
    %248 = vector.broadcast %cst_96 : f32 to vector<16x1xf32>
    %249 = arith.addf %245, %248 : vector<16x1xf32>
    %250 = math.rsqrt %249 : vector<16x1xf32>
    %251 = vector.broadcast %250 : vector<16x1xf32> to vector<16x32xf32>
    %252 = arith.mulf %247, %251 : vector<16x32xf32>
    %253 = vector.broadcast %232 : vector<1x32xf32> to vector<16x32xf32>
    %254 = arith.mulf %252, %253 : vector<16x32xf32>
    %255 = vector.broadcast %234 : vector<1x32xf32> to vector<16x32xf32>
    %256 = arith.addf %254, %255 : vector<16x32xf32>
    %c0_97 = arith.constant 0 : index
    %c0_98 = arith.constant 0 : index
    %257 = vector.load %arg24[%c0_97, %c0_98] : memref<16x32xf32, #tpu.memory_space<vmem>>, vector<16x32xf32>
    tpu.vector_store %arg24[%c0_97, %c0_98], %256 {strides = array<i32>} : memref<16x32xf32, #tpu.memory_space<vmem>>, vector<16x32xf32>,
    %c0_99 = arith.constant 0 : index
    %c0_100 = arith.constant 0 : index
    %c0_101 = arith.constant 0 : index
    %258 = vector.load %arg21[%c0_99, %c0_100, %c0_101] : memref<1x16x32xf32, #tpu.memory_space<vmem>>, vector<1x16x32xf32>
    %259 = vector.shape_cast %258 : vector<1x16x32xf32> to vector<16x32xf32>
    %260 = vector.shape_cast %256 : vector<16x32xf32> to vector<1x16x32xf32>
    tpu.vector_store %arg21[%c0_99, %c0_100, %c0_101], %260 {strides = array<i32>} : memref<1x16x32xf32, #tpu.memory_space<vmem>>, vector<1x16x32xf32>,
    %c1_i32 = arith.constant 1 : i32
    %261 = arith.cmpi eq, %arg0, %c1_i32 : i32
    %262 = arith.extui %261 : i1 to i32
    %c0_i32_102 = arith.constant 0 : i32
    %263 = arith.cmpi ne, %262, %c0_i32_102 : i32
    scf.if %263 {
      %264 = arith.truncf %256 : vector<16x32xf32> to vector<16x32xbf16>
      %c0_103 = arith.constant 0 : index
      %c0_104 = arith.constant 0 : index
      %265 = vector.load %arg3[%c0_103, %c0_104] : memref<64x32xbf16, #tpu.memory_space<vmem>>, vector<64x32xbf16>
      %cst_105 = arith.constant dense<0.000000e+00> : vector<16x64xf32>
      %266 = tpu.matmul %264, %265, %cst_105 {dimension_numbers = #tpu.dot_dimension_numbers<[1], [1], [0], [0], [0, 0, 1, 0], [], []>} : vector<16x32xbf16>, vector<64x32xbf16>, vector<16x64xf32> -> vector<16x64xf32>
      %c0_106 = arith.constant 0 : index
      %c0_107 = arith.constant 0 : index
      %267 = vector.load %arg22[%c0_106, %c0_107] : memref<16x64xf32, #tpu.memory_space<vmem>>, vector<16x64xf32>
      tpu.vector_store %arg22[%c0_106, %c0_107], %266 {strides = array<i32>} : memref<16x64xf32, #tpu.memory_space<vmem>>, vector<16x64xf32>,
      %268 = vector.extract_strided_slice %256 {offsets = [0, 0], sizes = [8, 32], strides = [1, 1]} : vector<16x32xf32> to vector<8x32xf32>
      %cst_108 = arith.constant dense<0xFF800000> : vector<32xf32>
      %269 = vector.multi_reduction <maximumf>, %268, %cst_108 [0] : vector<8x32xf32> to vector<32xf32>
      %270 = vector.shape_cast %269 : vector<32xf32> to vector<1x32xf32>
      %271 = vector.extract_strided_slice %256 {offsets = [8, 0], sizes = [8, 32], strides = [1, 1]} : vector<16x32xf32> to vector<8x32xf32>
      %cst_109 = arith.constant dense<0xFF800000> : vector<32xf32>
      %272 = vector.multi_reduction <maximumf>, %271, %cst_109 [0] : vector<8x32xf32> to vector<32xf32>
      %273 = vector.shape_cast %272 : vector<32xf32> to vector<1x32xf32>
      %274 = tpu.concatenate %270, %273 in 0 : vector<1x32xf32>, vector<1x32xf32> -> vector<2x32xf32>
      %275 = arith.truncf %274 : vector<2x32xf32> to vector<2x32xbf16>
      %c0_110 = arith.constant 0 : index
      %c0_111 = arith.constant 0 : index
      %276 = vector.load %arg4[%c0_110, %c0_111] : memref<32x3xbf16, #tpu.memory_space<vmem>>, vector<32x3xbf16>
      %cst_112 = arith.constant dense<0.000000e+00> : vector<2x3xf32>
      %277 = tpu.matmul %275, %276, %cst_112 {dimension_numbers = #tpu.dot_dimension_numbers<[1], [0], [0], [1], [0, 0, 1, 1], [], []>} : vector<2x32xbf16>, vector<32x3xbf16>, vector<2x3xf32> -> vector<2x3xf32>
      %c0_113 = arith.constant 0 : index
      %c0_114 = arith.constant 0 : index
      %278 = vector.load %arg5[%c0_113, %c0_114] : memref<1x3xf32, #tpu.memory_space<vmem>>, vector<1x3xf32>
      %279 = vector.broadcast %278 : vector<1x3xf32> to vector<2x3xf32>
      %280 = arith.addf %277, %279 : vector<2x3xf32>
      %281 = math.tanh %280 : vector<2x3xf32>
      %c0_115 = arith.constant 0 : index
      %c0_116 = arith.constant 0 : index
      %282 = vector.load %arg23[%c0_115, %c0_116] : memref<2x3xf32, #tpu.memory_space<vmem>>, vector<2x3xf32>
      tpu.vector_store %arg23[%c0_115, %c0_116], %281 {strides = array<i32>} : memref<2x3xf32, #tpu.memory_space<vmem>>, vector<2x3xf32>,
    } else {
    }
    return
  }
  func.func @transform_0(%arg0: i32) -> (i32, i32) {
    %c0_i32 = arith.constant 0 : i32
    %c0_i32_0 = arith.constant 0 : i32
    %c0_i32_1 = arith.constant 0 : i32
    return %c0_i32, %c0_i32_0 : i32, i32
  }
  func.func @transform_1(%arg0: i32) -> (i32, i32) {
    %c0_i32 = arith.constant 0 : i32
    %c0_i32_0 = arith.constant 0 : i32
    %c0_i32_1 = arith.constant 0 : i32
    return %c0_i32, %c0_i32_0 : i32, i32
  }
  func.func @transform_2(%arg0: i32) -> (i32, i32) {
    %c0_i32 = arith.constant 0 : i32
    %c0_i32_0 = arith.constant 0 : i32
    %c0_i32_1 = arith.constant 0 : i32
    return %c0_i32, %c0_i32_0 : i32, i32
  }
  func.func @transform_3(%arg0: i32) -> (i32, i32) {
    %c0_i32 = arith.constant 0 : i32
    %c0_i32_0 = arith.constant 0 : i32
    %c0_i32_1 = arith.constant 0 : i32
    return %c0_i32, %c0_i32_0 : i32, i32
  }
  func.func @transform_4(%arg0: i32) -> (i32, i32) {
    %c0_i32 = arith.constant 0 : i32
    %c0_i32_0 = arith.constant 0 : i32
    %c0_i32_1 = arith.constant 0 : i32
    return %c0_i32, %c0_i32_0 : i32, i32
  }
  func.func @transform_5(%arg0: i32) -> (i32, i32, i32) {
    %c0_i32 = arith.constant 0 : i32
    %c0_i32_0 = arith.constant 0 : i32
    %c0_i32_1 = arith.constant 0 : i32
    return %arg0, %c0_i32, %c0_i32_0 : i32, i32, i32
  }
  func.func @transform_6(%arg0: i32) -> (i32, i32, i32) {
    %c0_i32 = arith.constant 0 : i32
    %c0_i32_0 = arith.constant 0 : i32
    %c0_i32_1 = arith.constant 0 : i32
    return %arg0, %c0_i32, %c0_i32_0 : i32, i32, i32
  }
  func.func @transform_7(%arg0: i32) -> (i32, i32, i32) {
    %c0_i32 = arith.constant 0 : i32
    %c0_i32_0 = arith.constant 0 : i32
    %c0_i32_1 = arith.constant 0 : i32
    return %arg0, %c0_i32, %c0_i32_0 : i32, i32, i32
  }
  func.func @transform_8(%arg0: i32) -> (i32, i32, i32) {
    %c0_i32 = arith.constant 0 : i32
    %c0_i32_0 = arith.constant 0 : i32
    %c0_i32_1 = arith.constant 0 : i32
    return %arg0, %c0_i32, %c0_i32_0 : i32, i32, i32
  }
  func.func @transform_9(%arg0: i32) -> (i32, i32, i32) {
    %c0_i32 = arith.constant 0 : i32
    %c0_i32_0 = arith.constant 0 : i32
    %c0_i32_1 = arith.constant 0 : i32
    return %arg0, %c0_i32, %c0_i32_0 : i32, i32, i32
  }
  func.func @transform_10(%arg0: i32) -> (i32, i32, i32) {
    %c0_i32 = arith.constant 0 : i32
    %c0_i32_0 = arith.constant 0 : i32
    %c0_i32_1 = arith.constant 0 : i32
    return %arg0, %c0_i32, %c0_i32_0 : i32, i32, i32
  }
  func.func @transform_11(%arg0: i32) -> (i32, i32, i32) {
    %c0_i32 = arith.constant 0 : i32
    %c0_i32_0 = arith.constant 0 : i32
    %c0_i32_1 = arith.constant 0 : i32
    return %arg0, %c0_i32, %c0_i32_0 : i32, i32, i32
  }
  func.func @transform_12(%arg0: i32) -> (i32, i32, i32) {
    %c0_i32 = arith.constant 0 : i32
    %c0_i32_0 = arith.constant 0 : i32
    %c0_i32_1 = arith.constant 0 : i32
    return %arg0, %c0_i32, %c0_i32_0 : i32, i32, i32
  }
  func.func @transform_13(%arg0: i32) -> (i32, i32, i32) {
    %c0_i32 = arith.constant 0 : i32
    %c0_i32_0 = arith.constant 0 : i32
    %c0_i32_1 = arith.constant 0 : i32
    return %arg0, %c0_i32, %c0_i32_0 : i32, i32, i32
  }
  func.func @transform_14(%arg0: i32) -> (i32, i32, i32) {
    %c0_i32 = arith.constant 0 : i32
    %c0_i32_0 = arith.constant 0 : i32
    %c0_i32_1 = arith.constant 0 : i32
    return %arg0, %c0_i32, %c0_i32_0 : i32, i32, i32
  }
  func.func @transform_15(%arg0: i32) -> (i32, i32, i32) {
    %c0_i32 = arith.constant 0 : i32
    %c0_i32_0 = arith.constant 0 : i32
    %c0_i32_1 = arith.constant 0 : i32
    return %arg0, %c0_i32, %c0_i32_0 : i32, i32, i32
  }
  func.func @transform_16(%arg0: i32) -> (i32, i32, i32) {
    %c0_i32 = arith.constant 0 : i32
    %c0_i32_0 = arith.constant 0 : i32
    %c0_i32_1 = arith.constant 0 : i32
    return %arg0, %c0_i32, %c0_i32_0 : i32, i32, i32
  }
  func.func @transform_17(%arg0: i32) -> (i32, i32, i32) {
    %c0_i32 = arith.constant 0 : i32
    %c0_i32_0 = arith.constant 0 : i32
    %c0_i32_1 = arith.constant 0 : i32
    return %arg0, %c0_i32, %c0_i32_0 : i32, i32, i32
  }
  func.func @transform_18(%arg0: i32) -> (i32, i32, i32) {
    %c0_i32 = arith.constant 0 : i32
    %c0_i32_0 = arith.constant 0 : i32
    %c0_i32_1 = arith.constant 0 : i32
    return %arg0, %c0_i32, %c0_i32_0 : i32, i32, i32
  }
  func.func @transform_19(%arg0: i32) -> (i32, i32, i32) {
    %c0_i32 = arith.constant 0 : i32
    %c0_i32_0 = arith.constant 0 : i32
    %c0_i32_1 = arith.constant 0 : i32
    return %arg0, %c0_i32, %c0_i32_0 : i32, i32, i32
  }
  func.func @transform_20(%arg0: i32) -> (i32, i32, i32) {
    %c0_i32 = arith.constant 0 : i32
    %c0_i32_0 = arith.constant 0 : i32
    %c0_i32_1 = arith.constant 0 : i32
    return %arg0, %c0_i32, %c0_i32_0 : i32, i32, i32
  }
  func.func @transform_21(%arg0: i32) -> (i32, i32) {
    %c0_i32 = arith.constant 0 : i32
    %c0_i32_0 = arith.constant 0 : i32
    %c0_i32_1 = arith.constant 0 : i32
    return %c0_i32, %c0_i32_0 : i32, i32
  }
  func.func @transform_22(%arg0: i32) -> (i32, i32) {
    %c0_i32 = arith.constant 0 : i32
    %c0_i32_0 = arith.constant 0 : i32
    %c0_i32_1 = arith.constant 0 : i32
    return %c0_i32, %c0_i32_0 : i32, i32
  }
}

</mosaic_0001>

<bundles_post_ra>
// kernel: snli_forward_pallas.1
= control target key start
LH: loop header
LB: loop body
LE: loop exit
PB: predicated region body
PF: predicated region fallthrough
CT: control target
= control target key end

     0   :  { %s3450_s0 = inlined_call_operand.vmem [shape: f32[16,32], index: 0, kind: input, shape index: {}]   ;;  %s3451_s1 = inlined_call_operand.vmem [shape: bf16[8,32], index: 1, kind: input, shape index: {}]   ;;  %s3452_s2 = inlined_call_operand.vmem [shape: bf16[64,32], index: 2, kind: input, shape index: {}]   ;;  %s3453_s3 = inlined_call_operand.vmem [shape: bf16[32,3], index: 3, kind: input, shape index: {}]   ;;  %s3454_s4 = inlined_call_operand.vmem [shape: f32[1,3], index: 4, kind: input, shape index: {}]   ;;  %s3455_s5 = inlined_call_operand.vmem [shape: f32[2,1,32], index: 5, kind: input, shape index: {}]   ;;  %s3456_s6 = inlined_call_operand.vmem [shape: f32[2,1,32], index: 6, kind: input, shape index: {}]   ;;  %s3457_s7 = inlined_call_operand.vmem [shape: bf16[2,32,96], index: 7, kind: input, shape index: {}]   ;;  %s3458_s8 = inlined_call_operand.vmem [shape: f32[2,1,96], index: 8, kind: input, shape index: {}]   ;;  %s3459_s9 = inlined_call_operand.vmem [shape: bf16[2,32,32], index: 9, kind: input, shape index: {}]   ;;  %s3460_s10 = inlined_call_operand.vmem [shape: bf16[2,32,32], index: 10, kind: input, shape index: {}]   ;;  %s3461_s11 = inlined_call_operand.vmem [shape: f32[2,1,32], index: 11, kind: input, shape index: {}]   ;;  %s3462_s12 = inlined_call_operand.vmem [shape: f32[2,1,32], index: 12, kind: input, shape index: {}]   ;;  %s3463_s13 = inlined_call_operand.vmem [shape: f32[2,1,32], index: 13, kind: input, shape index: {}]   ;;  %s3464_s14 = inlined_call_operand.vmem [shape: bf16[2,32,64], index: 14, kind: input, shape index: {}]   ;;  %s3465_s15 = inlined_call_operand.vmem [shape: f32[2,1,64], index: 15, kind: input, shape index: {}]   ;;  %s3466_s16 = inlined_call_operand.vmem [shape: bf16[2,64,32], index: 16, kind: input, shape index: {}]   ;;  %s3467_s17 = inlined_call_operand.vmem [shape: f32[2,1,32], index: 17, kind: input, shape index: {}]   ;;  %s3468_s18 = inlined_call_operand.vmem [shape: f32[2,1,32], index: 18, kind: input, shape index: {}]   ;;  %s3469_s19 = inlined_call_operand.vmem [shape: f32[2,1,32], index: 19, kind: input, shape index: {}]   ;;  %s3470_s20 = inlined_call_operand.vmem [shape: f32[2,16,32], index: 20, kind: output, shape index: {0}]   ;;  %s3471_s21 = inlined_call_operand.vmem [shape: f32[16,64], index: 21, kind: output, shape index: {1}]   ;;  %s3472_s22 = inlined_call_operand.hbm [shape: f32[2,3], index: 22, kind: output, shape index: {2}]  }
   0x1   :  { %3481 = sst [smem:[#allocation9_spill]] %s3450_s0 }
   0x2   :  { %3482 = sst [smem:[#allocation10_spill]] %s3451_s1 }
   0x3   :  { %3483 = sst [smem:[#allocation11_spill]] %s3452_s2 }
   0x4   :  { %3484 = sst [smem:[#allocation12_spill]] %s3453_s3 }
   0x5   :  { %3485 = sst [smem:[#allocation13_spill]] %s3454_s4 }
   0x6   :  { %3486 = sst [smem:[#allocation14_spill]] %s3455_s5 }
   0x7   :  { %3487 = sst [smem:[#allocation15_spill]] %s3456_s6 }
   0x8   :  { %3488 = sst [smem:[#allocation16_spill]] %s3457_s7 }
   0x9   :  { %3489 = sst [smem:[#allocation17_spill]] %s3459_s9 }
   0xa   :  { %3490 = sst [smem:[#allocation18_spill]] %s3460_s10 }
   0xb   :  { %3491 = sst [smem:[#allocation19_spill]] %s3464_s14 }
   0xc   :  { %3492 = sst [smem:[#allocation20_spill]] %s3471_s21 }
   0xd   :  { %3493 = sst [smem:[#allocation21_spill]] %s3472_s22 }
   0xe   :  { %28 = vsyncpa [#allocation4], 0  ;;  %s3045_s3 = smov 0  }
   0xf LB: > { %3494 = sst [smem:[#allocation6_spill]] %s2918_s3  ;;  %s3051_s28 = sadd.s32 4294967295, %s2918_s3   ;;  %s2918_s3 = sphi %s3045_s3, %s34_s3  }
  0x10   : > { %3495 = sst [smem:[#allocation7_spill]] %s3051_s28  ;;  %p2539_p0 = scmp.ge.s32.totalorder %s2918_s3, 1 }
  0x11   : > { %p728_p1 = scmp.lt.s32.totalorder %s2918_s3, 3 }
  0x13   : > { %p729_p2 = pnand %p2539_p0, %p728_p1 }
  0x15   : > { %732 = sbr.rel (%p729_p2) target bundleno = 3841 (0xf01), region = 100 }
  0x1a   : > { %p840_p3 = scmp.lt.s32.totalorder %s3051_s28, 1  ;;  %s3498_s7 = sld [smem:[#allocation16_spill]] }
  0x1b   : > { %s3499_s9 = sld [smem:[#allocation17_spill]] }
  0x1c   : > { %s3057_s29 = scalar_select %p840_p3, %s3051_s28, 1 }
  0x1d   : > { %s3500_s10 = sld [smem:[#allocation18_spill]] }
  0x1e   : > { %s2608_s25 = sshll.u32 %s3057_s29, 4  ;;  %s3502_s14 = sld [smem:[#allocation19_spill]] }
  0x1f   : > { %s888_s6 = scalar_lea.vmem %s3467_s17, %s3057_s29  ;;  %s891_s21 = scalar_lea.vmem %s3468_s18, %s3057_s29 }
  0x20   : > { %s850_s3 = scalar_lea.vmem %s3498_s7, %s2608_s25  ;;  %s3503_s5 = sld [smem:[#allocation7_spill]] }
  0x21   : > { %s3078_s28 = scalar_lea.vmem %s3499_s9, %s2608_s25 }
  0x23   : > { %s3083_s1 = scalar_lea.vmem %s3500_s10, %s2608_s25  ;;  %s3127_s10 = scalar_lea.vmem %s3470_s20, %s2608_s25 }
  0x24   : > { %3501 = sst [smem:[#allocation8_spill]] %s3083_s1  ;;  %s3100_s9 = scalar_lea.vmem %s3502_s14, %s2608_s25 }
  0x25   : > { %s2612_s1 = sshll.u32 %s3057_s29, 5  ;;  %s894_s14 = scalar_lea.vmem %s3469_s19, %s3057_s29 }
  0x26   : > { %s3114_s27 = scalar_lea.vmem %s3466_s16, %s2612_s1  ;;  %p2552_p4 = scmp.ne.s32.totalorder %s3503_s5, 0 }
  0x27   : > { %s3504_s1 = sld [smem:[#allocation9_spill]] (!%p2552_p4) }
  0x28   : > { %904 = sbr.rel (%p2552_p4) target bundleno = 47 (0x2f), region = 104 }
  0x2d   : > { %v905_v0 = vld [vmem:[%s3504_s1] sm:$0xff]  ;;  %vm907_vm0 = vcmask 261120   ;;  %v906_v1 = vld [vmem:[%s3504_s1 + $0x8] sm:$0xff] }
  0x2e   : > { %908 = vst.msk [vmem:[#allocation2] sm:$0xff] %vm907_vm0, %v905_v0  ;;  %909 = vst.msk [vmem:[#allocation2 + $0x8] sm:$0xff] %vm907_vm0, %v906_v1 }
  0x2f PF: > { %v2836_v2 = vld [vmem:[%s850_s3 + $0x8] sm:$0xff]   ;;  %v2920_v3 = vmov 0.0   ;;  %v2837_v4 = vld [vmem:[%s850_s3] sm:$0xff]   ;;  %vm2921_vm1 = vmmov 0   ;;  %vm936_vm2 = vcmask 261120   ;;  %s3505_s25 = sld [smem:[#allocation10_spill]]  ;;  %s3506_s22 = scalar_lea.vmem %s3458_s8, %s3057_s29  ;;  %v1047_v40 = vlaneseq }
  0x30   : > { %2666 = vmatprep.subr.bf16.mxu1 %v2920_v3  ;;  %2682 = vmatprep.subr.bf16.mxu0 %v2920_v3  ;;  %v2838_v8 = vld [vmem:[%s3078_s28 + $0x8] sm:$0xff]   ;;  %v2839_v9 = vld [vmem:[%s3078_s28] sm:$0xff]   ;;  %s3507_s5 = sld [smem:[#allocation15_spill]]  ;;  %s2922_s3 = smov 112   ;;  %vm1075_vm3 = vcmask 130048   ;;  %vm1174_vm5 = vcmask 64512  }
  0x31   : > { %2667 = vmatpush3.bf16.msra.mxu1 %v2836_v2  ;;  %2670 = vmatprep.mubr.msk.bf16.mxu1 %vm2921_vm1, %v2920_v3  ;;  %v2553_v11 = vld [vmem:[%s3506_s22] ss:$0 sm:$0xff]  ;;  %s3509_s30 = sld [smem:[#allocation14_spill]]  ;;  %s2924_s4 = smov 96   ;;  %v3216_v43 = vshrl.u32 %v1047_v40, 7  ;;  %v3218_v44 = vand.u32 127, %v1047_v40 }
  0x32   : > { %2668 = vmatprep.subr.bf16.mxu1 %v2920_v3  ;;  %2684 = vmatprep.mubr.msk.bf16.mxu0 %vm2921_vm1, %v2920_v3  ;;  %s2925_s28 = smov 64   ;;  %s2926_s22 = smov 48   ;;  %vm1192_vm6 = vcmask 1043456   ;;  %vm2040_vm7 = vcmask 523264  }
  0x33   : > { %vm1172_vm4 = vcmp.gt.s32.totalorder %v3218_v44, %v3216_v43  ;;  %s3511_s23 = sld [smem:[#allocation8_spill]] }
  0x35   : > { %v3140_v5 = vld [vmem:[#allocation2] sm:$0xff]  ;;  %v3142_v6 = vld [vmem:[#allocation2 + $0x8] sm:$0xff]  ;;  %2669 = vmatpush3.bf16.msra.mxu1 %v2837_v4 }
  0x36   : > { %v912_v7 = vpack.c.bf16 %v3142_v6, %v3140_v5  ;;  %2674 = vmatprep.subr.bf16.mxu1 %v2920_v3  ;;  %v981_v10 = vld [vmem:[%s3505_s25] sm:$0xf]  ;;  %s3508_s24 = scalar_lea.vmem %s3507_s5, %s3057_s29  ;;  %s2923_s25 = smov 80  }
  0x37   : > { %v2561_v13 = vld [vmem:[%s3508_s24] ss:$0 sm:$0xff]  ;;  %s3510_s7 = scalar_lea.vmem %s3509_s30, %s3057_s29  ;;  %s3512_s24 = scalar_lea.vmem %s3461_s11, %s3057_s29 }
  0x38   : > { %2671 = vmatmul.mubr.msk.bf16.vlgmr.msra.gmra.mxu1 %vm936_vm2, %v912_v7  ;;  %v2560_v20 = vld [vmem:[%s3510_s7] ss:$0 sm:$0xff] }
  0x39   : > { %2675 = vmatpush3.bf16.msra.mxu1 %v2838_v8  ;;  %2678 = vmatprep.mubr.msk.bf16.mxu1 %vm2921_vm1, %v2920_v3  ;;  %v2579_v43 = vld [vmem:[%s3512_s24] ss:$0 sm:$0xff] }
  0x3a   : > { %2676 = vmatprep.subr.bf16.mxu1 %v2920_v3 }
  0x3d   : > { %2677 = vmatpush3.bf16.msra.mxu1 %v2839_v9 }
  0x3e   : > { %2688 = vmatprep.subr.bf16.mxu1 %v2920_v3 }
  0x40   : > { %2679 = vmatmul.mubr.msk.bf16.vlgmr.msra.gmra.mxu1 %vm936_vm2, %v981_v10 }
  0x41   : > { %2690 = vmatprep.mubr.msk.bf16.mxu1 %vm2921_vm1, %v2920_v3 }
  0xf8   : > { %v974_v12 = vpop.f32.mrf.mxu1 }
  0xf9   : > { %v975_v14 = vadd.f32 %v2553_v11, %v974_v12 }
  0xfa   : > { %v2672_v15 = vpop.f32.mrf.mxu1 }
  0xfb   : > { %v1066_v16 = vadd.f32 %v2561_v13, %v975_v14  ;;  %v3187_v25 = vpack.c.bf16 %v975_v14, %v975_v14  ;;  %v1057_v29 = vadd.f32 %v2560_v20, %v975_v14 }
  0xfc   : > { %v977_v17 = vpop.f32.mrf.mxu1 }
  0xfd   : > { %v3173_v18 = vadd.f32 %v2553_v11, %v977_v17  ;;  %v1067_v19 = vpack.c.bf16 %v1066_v16, %v1066_v16  ;;  %v1058_v31 = vpack.c.bf16 %v1057_v29, %v1057_v29 }
  0xfe   : > { %v2673_v21 = vpop.f32.mrf.mxu1 }
  0xff   : > { %v3181_v22 = vadd.f32 %v2560_v20, %v3173_v18  ;;  %1070 = vrot.lane.b32.xlu1 %v1067_v19, %s2922_s3  ;;  %v3185_v23 = vadd.f32 %v2561_v13, %v3173_v18  ;;  %v3238_v11 = vpack.c.bf16 %v3173_v18, %v3173_v18 }
 0x100   : > { %v1035_v24 = vpop.f32.mrf.mxu1 }
 0x101   : > { %v3189_v26 = vpack.c.bf16 %v1035_v24, %v1035_v24 }
 0x102   : > { %v2680_v27 = vpop.f32.mrf.mxu1 }
 0x103   : > { %1240 = vrot.lane.b32.xlu1 %v3187_v25, %s2923_s25  ;;  %1073 = vrot.lane.b32.xlu0 %v3189_v26, %s2922_s3 }
 0x104   : > { %v1038_v28 = vpop.f32.mrf.mxu1 }
 0x105   : > { %v3258_v28 = vld [vmem:[%s3511_s23 + $0x8] sm:$0xff]  }
 0x106   : > { %v2681_v30 = vpop.f32.mrf.mxu1 }
 0x107   : > { %1123 = vrot.lane.b32.xlu0 %v3187_v25, %s2924_s4 }
 0x10b   : > { %1238 = vrot.lane.b32.xlu0 %v1058_v31, %s2922_s3 }
 0x171   : > { %v1071_v34 = vpop.permute.xlu1 %1070 }
 0x175   : > { %v1074_v32 = vpop.permute.xlu0 %1073  ;;  %v1241_v37 = vpop.permute.xlu1 %1240 }
 0x176   : > { %v3199_v33 = vsel %vm1075_vm3, %v1074_v32, 0  ;;  %v1246_v38 = vsel %vm1075_vm3, %v1241_v37, 0 }
 0x177   : > { %2683 = vmatpush3.bf16.xpose.msra.mxu0 %v3199_v33 }
 0x178   : > { %2694 = vmatprep.subr.bf16.mxu0 %v2920_v3 }
 0x179   : > { %v1124_v35 = vpop.permute.xlu0 %1123 }
 0x17a   : > { %v1129_v36 = vsel %vm1075_vm3, %v1124_v35, 0 }
 0x17b   : > { %2689 = vmatpush3.bf16.xpose.msra.mxu1 %v1129_v36 }
 0x17c   : > { %2700 = vmatprep.subr.bf16.mxu1 %v2920_v3 }
 0x17d   : > { %v1239_v39 = vpop.permute.xlu0 %1238 }
 0x17e   : > { %2685 = vmatmul.mubr.msk.bf16.vlgmr.msra.gmra.mxu0 %vm1075_vm3, %v1071_v34 }
 0x17f   : > { %2696 = vmatprep.mubr.msk.bf16.mxu0 %vm2921_vm1, %v2920_v3 }
 0x182   : > { %2691 = vmatmul.mubr.msk.bf16.vlgmr.msra.gmra.mxu1 %vm1075_vm3, %v1058_v31 }
 0x183   : > { %2701 = vmatpush3.bf16.xpose.msra.mxu1 %v1246_v38  ;;  %2702 = vmatprep.mubr.msk.bf16.mxu1 %vm2921_vm1, %v2920_v3  ;;  %v1450_v38 = vpack.c.bf16 %v3181_v22, %v3181_v22  ;;  %v1453_v22 = vpack.c.bf16 %v3185_v23, %v3185_v23 }
 0x184   : > { %2712 = vmatprep.subr.bf16.mxu1 %v2920_v3 }
 0x18a   : > { %2703 = vmatmul.mubr.msk.bf16.vlgmr.msra.gmra.mxu1 %vm1075_vm3, %v1239_v39 }
 0x18b   : > { %2714 = vmatprep.mubr.msk.bf16.mxu1 %vm2921_vm1, %v2920_v3  ;;  %2713 = vmatpush3.bf16.msra.mxu1 %v3258_v28 }
 0x18c   : > { %2724 = vmatprep.subr.bf16.mxu1 %v2920_v3 }
 0x23e   : > { %v1116_v41 = vpop.f32.mrf.mxu0 }
 0x240   : > { %v2686_v42 = vpop.f32.mrf.mxu0 }
 0x242   : > { %v1119_v45 = vpop.f32.mrf.mxu0  ;;  %v1165_v46 = vpop.f32.mrf.mxu1 }
 0x243   : > { %v1166_v47 = vadd.f32 %v1165_v46, %v1116_v41  ;;  %v1458_v41 = vsel %vm1075_vm3, %v3189_v26, 0 }
 0x244   : > { %v2687_v48 = vpop.f32.mrf.mxu0  ;;  %v2692_v49 = vpop.f32.mrf.mxu1 }
 0x245   : > { %v1171_v50 = vmul.f32 0.25, %v1166_v47 }
 0x246   : > { %v1168_v51 = vpop.f32.mrf.mxu1 }
 0x247   : > { %v1173_v52 = vsel %vm1172_vm4, -1e+09, %v1171_v50 }
 0x248   : > { %v2693_v53 = vpop.f32.mrf.mxu1  ;;  %v1175_v54 = vsel %vm1174_vm5, %v1173_v52, -inf }
 0x249   : > { %1176 = vmax.xlane.f32.xlu1 %v1175_v54 }
 0x24a   : > { %v1282_v55 = vpop.f32.mrf.mxu1 }
 0x24b   : > { %v1288_v56 = vmul.f32 0.25, %v1282_v55 }
 0x24c   : > { %v2704_v57 = vpop.f32.mrf.mxu1 }
 0x24d   : > { %v1289_v58 = vsel %vm1172_vm4, -1e+09, %v1288_v56 }
 0x24e   : > { %v1285_v59 = vpop.f32.mrf.mxu1  ;;  %v1290_v60 = vsel %vm1174_vm5, %v1289_v58, -inf }
 0x24f   : > { %1291 = vmax.xlane.f32.xlu0 %v1290_v60 }
 0x250   : > { %v2705_v61 = vpop.f32.mrf.mxu1 }
 0x2d2   : > { %v1177_v62 = vpop.xlane.xlu1 %1176 }
 0x2d3   : > { %v1178_v63 = vsub.f32 %v1173_v52, %v1177_v62 }
 0x2d5   : > { %v1179_v0 = vmul.f32 1.442695, %v1178_v63 }
 0x2d7   : > { %2848 = vpow2.f32 %v1179_v0 }
 0x2d8   : > { %v1292_v1 = vpop.xlane.xlu0 %1291 }
 0x2d9   : > { %v1293_v2 = vsub.f32 %v1289_v58, %v1292_v1 }
 0x2db   : > { %v1294_v4 = vmul.f32 1.442695, %v1293_v2 }
 0x2dd   : > { %2850 = vpow2.f32 %v1294_v4 }
 0x2e4   : > { %v2849_v7 = vpop.eup %2848 }
 0x2e5   : > { %v1181_v8 = vsel %vm1174_vm5, %v2849_v7, 0.0 }
 0x2e6   : > { %1182 = vadd.xlane.f32.xlu0 %v1181_v8 }
 0x2ea   : > { %v2851_v9 = vpop.eup %2850 }
 0x2eb   : > { %v1296_v10 = vsel %vm1174_vm5, %v2851_v9, 0.0 }
 0x2ec   : > { %1297 = vadd.xlane.f32.xlu1 %v1296_v10 }
 0x2fc   : > { %1187 = vrot.lane.b32.xlu0 %v3187_v25, %s2925_s28 }
 0x2fd   : > { %1302 = vrot.lane.b32.xlu1 %v3187_v25, %s2926_s22  ;;  %v3250_v25 = vld [vmem:[%s3511_s23] sm:$0xff]  }
 0x301   : > { %1501 = vrot.lane.b32.xlu1 %v3238_v11, %s2924_s4 }
 0x36f   : > { %v1183_v12 = vpop.xlane.xlu0 %1182 }
 0x370   : > { %2852 = vrcp.f32 %v1183_v12 }
 0x373   : > { %v1188_v13 = vpop.permute.xlu0 %1187 }
 0x374   : > { %v1194_v14 = vsel %vm1192_vm6, %v1188_v13, 0 }
 0x375   : > { %v1298_v15 = vpop.xlane.xlu1 %1297  ;;  %2695 = vmatpush3.bf16.msra.mxu0 %v1194_v14 }
 0x376   : > { %2854 = vrcp.f32 %v1298_v15  ;;  %2706 = vmatprep.subr.bf16.mxu0 %v2920_v3 }
 0x379   : > { %v1303_v18 = vpop.permute.xlu1 %1302 }
 0x37a   : > { %v1308_v20 = vsel %vm1192_vm6, %v1303_v18, 0 }
 0x37d   : > { %v2853_v16 = vpop.eup %2852  ;;  %v1502_v29 = vpop.permute.xlu1 %1501 }
 0x37e   : > { %v1185_v17 = vmul.f32 %v2853_v16, %v2849_v7  ;;  %v1507_v34 = vsel %vm1075_vm3, %v1502_v29, 0 }
 0x380   : > { %v1186_v19 = vpack.c.bf16 %v1185_v17, %v1185_v17 }
 0x382   : > { %2697 = vmatmul.mubr.msk.bf16.vlgmr.msra.gmra.mxu0 %vm1174_vm5, %v1186_v19 }
 0x383   : > { %v2855_v21 = vpop.eup %2854  ;;  %2707 = vmatpush3.bf16.msra.mxu0 %v1308_v20  ;;  %2708 = vmatprep.mubr.msk.bf16.mxu0 %vm2921_vm1, %v2920_v3 }
 0x384   : > { %v1300_v24 = vmul.f32 %v2855_v21, %v2851_v9  ;;  %2718 = vmatprep.subr.bf16.mxu0 %v2920_v3 }
 0x386   : > { %v1301_v27 = vpack.c.bf16 %v1300_v24, %v1300_v24 }
 0x38a   : > { %2709 = vmatmul.mubr.msk.bf16.vlgmr.msra.gmra.mxu0 %vm1174_vm5, %v1301_v27 }
 0x38b   : > { %2719 = vmatpush3.bf16.msra.mxu0 %v3250_v25  ;;  %2720 = vmatprep.mubr.msk.bf16.mxu0 %vm2921_vm1, %v2920_v3 }
 0x38c   : > { %2730 = vmatprep.subr.bf16.mxu0 %v2920_v3 }
 0x442   : > { %v1230_v30 = vpop.f32.mrf.mxu0 }
 0x443   : > { %v1236_v31 = vpack.c.bf16 %v1230_v30, %v1230_v30 }
 0x444   : > { %v2698_v32 = vpop.f32.mrf.mxu0 }
 0x445   : > { %2721 = vmatmul.mubr.msk.bf16.vlgmr.msra.gmra.mxu0 %vm1075_vm3, %v1236_v31 }
 0x446   : > { %2731 = vmatpush3.bf16.xpose.msra.mxu0 %v1507_v34  ;;  %v1233_v35 = vpop.f32.mrf.mxu0  ;;  %2732 = vmatprep.mubr.msk.bf16.mxu0 %vm2921_vm1, %v2920_v3 }
 0x447   : > { %2742 = vmatprep.subr.bf16.mxu0 %v2920_v3 }
 0x448   : > { %v2699_v36 = vpop.f32.mrf.mxu0 }
 0x44a   : > { %v1344_v37 = vpop.f32.mrf.mxu0 }
 0x44b   : > { %v1350_v39 = vpack.c.bf16 %v1344_v37, %v1344_v37 }
 0x44c   : > { %v2710_v40 = vpop.f32.mrf.mxu0 }
 0x44d   : > { %2715 = vmatmul.mubr.msk.bf16.vlgmr.msra.gmra.mxu1 %vm1075_vm3, %v1350_v39  ;;  %2733 = vmatmul.mubr.msk.bf16.vlgmr.msra.gmra.mxu0 %vm1075_vm3, %v1450_v38 }
 0x44e   : > { %2725 = vmatpush3.bf16.xpose.msra.mxu1 %v1458_v41  ;;  %2743 = vmatpush3.bf16.xpose.msra.mxu0 %v3199_v33  ;;  %v1347_v42 = vpop.f32.mrf.mxu0 }
 0x44f   : > { %2726 = vmatprep.mubr.msk.bf16.mxu1 %vm2921_vm1, %v2920_v3  ;;  %2736 = vmatprep.subr.bf16.mxu1 %v2920_v3 }
 0x450   : > { %v2711_v45 = vpop.f32.mrf.mxu0  ;;  %2744 = vmatprep.mubr.msk.bf16.mxu0 %vm2921_vm1, %v2920_v3  ;;  %2754 = vmatprep.subr.bf16.mxu0 %v2920_v3 }
 0x455   : > { %2727 = vmatmul.mubr.msk.bf16.vlgmr.msra.gmra.mxu1 %vm1075_vm3, %v1453_v22 }
 0x456   : > { %2738 = vmatprep.mubr.msk.bf16.mxu1 %vm2921_vm1, %v2920_v3 }
 0x505   : > { %v1443_v26 = vpop.f32.mrf.mxu0 }
 0x507   : > { %v2722_v33 = vpop.f32.mrf.mxu0 }
 0x509   : > { %v1446_v46 = vpop.f32.mrf.mxu0 }
 0x50b   : > { %v2723_v47 = vpop.f32.mrf.mxu0 }
 0x50d   : > { %v1394_v48 = vpop.f32.mrf.mxu1  ;;  %v1543_v49 = vpop.f32.mrf.mxu0 }
 0x50e   : > { %v3285_v50 = vadd.f32 %v1443_v26, %v1394_v48 }
 0x50f   : > { %v2716_v51 = vpop.f32.mrf.mxu1  ;;  %v2734_v52 = vpop.f32.mrf.mxu0 }
 0x510   : > { %v1865_v44 = vadd.f32 %v2579_v43, %v3285_v50 }
 0x511   : > { %v1397_v53 = vpop.f32.mrf.mxu1  ;;  %v1546_v54 = vpop.f32.mrf.mxu0 }
 0x512   : > { %v1867_v33 = vadd.f32 %v1865_v44, %v3140_v5 }
 0x513   : > { %v2717_v55 = vpop.f32.mrf.mxu1  ;;  %v2735_v56 = vpop.f32.mrf.mxu0 }
 0x514   : > { %v1871_v46 = vsel %vm936_vm2, %v1867_v33, 0.0 }
 0x515   : > { %v1494_v23 = vpop.f32.mrf.mxu1 }
 0x516   : > { %v1544_v57 = vadd.f32 %v1543_v49, %v1494_v23 }
 0x517   : > { %v2728_v58 = vpop.f32.mrf.mxu1 }
 0x518   : > { %v1549_v59 = vmul.f32 0.25, %v1544_v57 }
 0x519   : > { %v1497_v60 = vpop.f32.mrf.mxu1 }
 0x51a   : > { %v1550_v61 = vsel %vm1172_vm4, -1e+09, %v1549_v59 }
 0x51b   : > { %v2729_v62 = vpop.f32.mrf.mxu1  ;;  %v1551_v63 = vsel %vm1174_vm5, %v1550_v61, -inf }
 0x51c   : > { %1552 = vmax.xlane.f32.xlu0 %v1551_v63 }
 0x532   : > { %1563 = vrot.lane.b32.xlu0 %v3238_v11, %s2925_s28  ;;  %s3515_s28 = scalar_lea.vmem %s3465_s15, %s3057_s29 }
 0x536   : > { %1613 = vrot.lane.b32.xlu0 %v1453_v22, %s2922_s3 }
 0x5a5   : > { %v1553_v0 = vpop.xlane.xlu0 %1552 }
 0x5a6   : > { %v1554_v1 = vsub.f32 %v1550_v61, %v1553_v0 }
 0x5a8   : > { %v1555_v2 = vmul.f32 1.442695, %v1554_v1 }
 0x5a9   : > { %v1564_v4 = vpop.permute.xlu0 %1563 }
 0x5aa   : > { %2856 = vpow2.f32 %v1555_v2  ;;  %v1569_v7 = vsel %vm1192_vm6, %v1564_v4, 0 }
 0x5ab   : > { %2737 = vmatpush3.bf16.msra.mxu1 %v1569_v7 }
 0x5ac   : > { %2748 = vmatprep.subr.bf16.mxu1 %v2920_v3 }
 0x5ad   : > { %v1614_v8 = vpop.permute.xlu0 %1613 }
 0x5ae   : > { %2745 = vmatmul.mubr.msk.bf16.vlgmr.msra.gmra.mxu0 %vm1075_vm3, %v1614_v8 }
 0x5af   : > { %2756 = vmatprep.mubr.msk.bf16.mxu0 %vm2921_vm1, %v2920_v3 }
 0x5b7   : > { %v2857_v9 = vpop.eup %2856 }
 0x5b8   : > { %v1557_v10 = vsel %vm1174_vm5, %v2857_v9, 0.0 }
 0x5b9   : > { %1558 = vadd.xlane.f32.xlu1 %v1557_v10 }
 0x5ca   : > { %1661 = vrot.lane.b32.xlu1 %v3238_v11, %s2923_s25 }
 0x5ce   : > { %1659 = vrot.lane.b32.xlu1 %v1450_v38, %s2922_s3  ;;  %s3514_s3 = scalar_lea.vmem %s3463_s13, %s3057_s29 }
 0x642   : > { %v1559_v12 = vpop.xlane.xlu1 %1558 }
 0x643   : > { %2858 = vrcp.f32 %v1559_v12 }
 0x646   : > { %v1662_v15 = vpop.permute.xlu1 %1661 }
 0x647   : > { %v1667_v17 = vsel %vm1075_vm3, %v1662_v15, 0 }
 0x64a   : > { %v1660_v18 = vpop.permute.xlu1 %1659 }
 0x650   : > { %v2859_v13 = vpop.eup %2858 }
 0x651   : > { %v1561_v14 = vmul.f32 %v2859_v13, %v2857_v9 }
 0x653   : > { %v1562_v16 = vpack.c.bf16 %v1561_v14, %v1561_v14 }
 0x655   : > { %2739 = vmatmul.mubr.msk.bf16.vlgmr.msra.gmra.mxu1 %vm1174_vm5, %v1562_v16  ;;  %v2842_v16 = vld [vmem:[%s3100_s9 + $0x8] sm:$0xff]  }
 0x656   : > { %2749 = vmatpush3.bf16.xpose.msra.mxu1 %v1667_v17  ;;  %2750 = vmatprep.mubr.msk.bf16.mxu1 %vm2921_vm1, %v2920_v3  ;;  %v2843_v17 = vld [vmem:[%s3100_s9] sm:$0xff]   ;;  %s3513_s9 = scalar_lea.vmem %s3462_s12, %s3057_s29 }
 0x657   : > { %2760 = vmatprep.subr.bf16.mxu1 %v2920_v3 }
 0x65d   : > { %2751 = vmatmul.mubr.msk.bf16.vlgmr.msra.gmra.mxu1 %vm1075_vm3, %v1660_v18 }
 0x65e   : > { %2761 = vmatpush3.bf16.msra.mxu1 %v3258_v28  ;;  %2762 = vmatprep.mubr.msk.bf16.mxu1 %vm2921_vm1, %v2920_v3 }
 0x65f   : > { %2772 = vmatprep.subr.bf16.mxu1 %v2920_v3 }
 0x66e   : > { %v1652_v19 = vpop.f32.mrf.mxu0 }
 0x670   : > { %v2746_v20 = vpop.f32.mrf.mxu0 }
 0x672   : > { %v1655_v21 = vpop.f32.mrf.mxu0 }
 0x674   : > { %v2747_v24 = vpop.f32.mrf.mxu0 }
 0x715   : > { %v1605_v27 = vpop.f32.mrf.mxu1 }
 0x716   : > { %v1611_v50 = vpack.c.bf16 %v1605_v27, %v1605_v27 }
 0x717   : > { %v2740_v29 = vpop.f32.mrf.mxu1 }
 0x719   : > { %v1608_v30 = vpop.f32.mrf.mxu1 }
 0x71a   : > { %v2580_v30 = vld [vmem:[%s3513_s9] ss:$0 sm:$0xff] }
 0x71b   : > { %v2741_v31 = vpop.f32.mrf.mxu1 }
 0x71d   : > { %v1703_v32 = vpop.f32.mrf.mxu1 }
 0x71e   : > { %v1704_v34 = vadd.f32 %v1703_v32, %v1652_v19 }
 0x71f   : > { %v2752_v35 = vpop.f32.mrf.mxu1 }
 0x720   : > { %v1709_v36 = vmul.f32 0.25, %v1704_v34  ;;  %v2581_v35 = vld [vmem:[%s3514_s3] ss:$0 sm:$0xff] }
 0x721   : > { %v1706_v37 = vpop.f32.mrf.mxu1 }
 0x722   : > { %v1710_v28 = vsel %vm1172_vm4, -1e+09, %v1709_v36 }
 0x723   : > { %v2753_v38 = vpop.f32.mrf.mxu1  ;;  %v1711_v39 = vsel %vm1174_vm5, %v1710_v28, -inf }
 0x724   : > { %1712 = vmax.xlane.f32.xlu0 %v1711_v39  ;;  %v2844_v39 = vld [vmem:[%s3114_s27 + $0x18] sm:$0xff]  }
 0x73a   : > { %1723 = vrot.lane.b32.xlu0 %v3238_v11, %s2926_s22 }
 0x7ad   : > { %v1713_v40 = vpop.xlane.xlu0 %1712 }
 0x7ae   : > { %v1714_v41 = vsub.f32 %v1710_v28, %v1713_v40  ;;  %v2845_v40 = vld [vmem:[%s3114_s27 + $0x10] sm:$0xff]  }
 0x7b0   : > { %v1715_v42 = vmul.f32 1.442695, %v1714_v41  ;;  %v2846_v41 = vld [vmem:[%s3114_s27 + $0x8] sm:$0xff]  }
 0x7b1   : > { %v1724_v45 = vpop.permute.xlu0 %1723 }
 0x7b2   : > { %2860 = vpow2.f32 %v1715_v42  ;;  %v1729_v22 = vsel %vm1192_vm6, %v1724_v45, 0  ;;  %v2847_v42 = vld [vmem:[%s3114_s27] sm:$0xff]  }
 0x7b3   : > { %2755 = vmatpush3.bf16.msra.mxu0 %v1729_v22  ;;  %v2582_v45 = vld [vmem:[%s3515_s28] ss:$0 sm:$0xff] }
 0x7b4   : > { %2766 = vmatprep.subr.bf16.mxu0 %v2920_v3 }
 0x7bf   : > { %v2861_v26 = vpop.eup %2860 }
 0x7c0   : > { %v1717_v11 = vsel %vm1174_vm5, %v2861_v26, 0.0 }
 0x7c1   : > { %1718 = vadd.xlane.f32.xlu1 %v1717_v11 }
 0x7c5   : > { %1872 = vadd.xlane.f32.xlu1 %v1871_v46 }
 0x84a   : > { %v1719_v47 = vpop.xlane.xlu1 %1718 }
 0x84b   : > { %2862 = vrcp.f32 %v1719_v47 }
 0x84e   : > { %v1873_v58 = vpop.xlane.xlu1 %1872 }
 0x84f   : > { %v1878_v59 = vmul.f32 0.03125, %v1873_v58 }
 0x851   : > { %v1880_v63 = vsub.f32 %v1867_v33, %v1878_v59 }
 0x853   : > { %v1882_v8 = vmul.f32 %v1880_v63, %v1880_v63 }
 0x855   : > { %v1884_v9 = vsel %vm936_vm2, %v1882_v8, 0.0 }
 0x858   : > { %v2863_v48 = vpop.eup %2862 }
 0x859   : > { %v1721_v49 = vmul.f32 %v2863_v48, %v2861_v26 }
 0x85b   : > { %v1722_v51 = vpack.c.bf16 %v1721_v49, %v1721_v49 }
 0x85d   : > { %2757 = vmatmul.mubr.msk.bf16.vlgmr.msra.gmra.mxu0 %vm1174_vm5, %v1722_v51 }
 0x85e   : > { %2767 = vmatpush3.bf16.msra.mxu0 %v3250_v25  ;;  %2768 = vmatprep.mubr.msk.bf16.mxu0 %vm2921_vm1, %v2920_v3 }
 0x85f   : > { %2780 = vmatprep.subr.bf16.mxu0 %v2920_v3 }
 0x865   : > { %2769 = vmatmul.mubr.msk.bf16.vlgmr.msra.gmra.mxu0 %vm1075_vm3, %v1611_v50 }
 0x866   : > { %2788 = vmatprep.mubr.msk.bf16.mxu0 %vm2921_vm1, %v2920_v3  ;;  %2781 = vmatpush3.bf16.msra.mxu0 %v2844_v39 }
 0x867   : > { %2782 = vmatprep.subr.bf16.mxu0 %v2920_v3 }
 0x86a   : > { %2783 = vmatpush3.bf16.msra.mxu0 %v2845_v40 }
 0x86b   : > { %2784 = vmatprep.subr.bf16.mxu0 %v2920_v3 }
 0x86e   : > { %2785 = vmatpush3.bf16.msra.mxu0 %v2846_v41 }
 0x86f   : > { %2786 = vmatprep.subr.bf16.mxu0 %v2920_v3 }
 0x872   : > { %2787 = vmatpush3.bf16.msra.mxu0 %v2847_v42 }
 0x91d   : > { %v1765_v5 = vpop.f32.mrf.mxu0 }
 0x91e   : > { %v1771_v52 = vpack.c.bf16 %v1765_v5, %v1765_v5 }
 0x91f   : > { %v2758_v53 = vpop.f32.mrf.mxu0 }
 0x920   : > { %2763 = vmatmul.mubr.msk.bf16.vlgmr.msra.gmra.mxu1 %vm1075_vm3, %v1771_v52 }
 0x921   : > { %v1768_v54 = vpop.f32.mrf.mxu0  ;;  %2776 = vmatprep.mubr.msk.bf16.mxu1 %vm2921_vm1, %v2920_v3  ;;  %2773 = vmatpush3.bf16.msra.mxu1 %v2842_v16 }
 0x922   : > { %2774 = vmatprep.subr.bf16.mxu1 %v2920_v3 }
 0x923   : > { %v2759_v25 = vpop.f32.mrf.mxu0 }
 0x925   : > { %v1852_v55 = vpop.f32.mrf.mxu0  ;;  %2775 = vmatpush3.bf16.msra.mxu1 %v2843_v17 }
 0x927   : > { %v2770_v56 = vpop.f32.mrf.mxu0 }
 0x929   : > { %v1855_v23 = vpop.f32.mrf.mxu0 }
 0x92b   : > { %v2771_v57 = vpop.f32.mrf.mxu0 }
 0x9e0   : > { %v1809_v60 = vpop.f32.mrf.mxu1 }
 0x9e1   : > { %v1853_v61 = vadd.f32 %v1852_v55, %v1809_v60 }
 0x9e2   : > { %v2764_v62 = vpop.f32.mrf.mxu1 }
 0x9e3   : > { %v1866_v0 = vadd.f32 %v2579_v43, %v1853_v61  ;;  %v2586_v61 = vld [vmem:[%s888_s6] ss:$0 sm:$0xff] }
 0x9e4   : > { %v1812_v1 = vpop.f32.mrf.mxu1 }
 0x9e5   : > { %v1868_v2 = vadd.f32 %v1866_v0, %v3142_v6 }
 0x9e6   : > { %v2765_v4 = vpop.f32.mrf.mxu1 }
 0x9e7   : > { %v1874_v7 = vsel %vm936_vm2, %v1868_v2, 0.0 }
 0x9e8   : > { %1875 = vadd.xlane.f32.xlu1 %v1874_v7 }
 0x9ec   : > { %1885 = vadd.xlane.f32.xlu1 %v1884_v9 }
 0xa71   : > { %v1876_v10 = vpop.xlane.xlu1 %1875 }
 0xa72   : > { %v1879_v12 = vmul.f32 0.03125, %v1876_v10 }
 0xa74   : > { %v1881_v13 = vsub.f32 %v1868_v2, %v1879_v12 }
 0xa75   : > { %v1886_v6 = vpop.xlane.xlu1 %1885 }
 0xa76   : > { %v1883_v14 = vmul.f32 %v1881_v13, %v1881_v13  ;;  %v1890_v18 = vmul.f32 0.03125, %v1886_v6 }
 0xa78   : > { %v1887_v15 = vsel %vm936_vm2, %v1883_v14, 0.0  ;;  %v1892_v19 = vadd.f32 1e-05, %v1890_v18 }
 0xa79   : > { %1888 = vadd.xlane.f32.xlu1 %v1887_v15 }
 0xa7a   : > { %2864 = vrsqrt.f32 %v1892_v19 }
 0xa87   : > { %v2865_v27 = vpop.eup %2864 }
 0xa88   : > { %v1896_v29 = vmul.f32 %v2865_v27, %v1880_v63 }
 0xa8a   : > { %v1904_v34 = vmul.f32 %v2580_v30, %v1896_v29 }
 0xa8c   : > { %v1912_v37 = vadd.f32 %v2581_v35, %v1904_v34  ;;  %v2592_v34 = vld [vmem:[%s891_s21] ss:$0 sm:$0xff]  ;;  %s3516_s21 = sld [smem:[#allocation7_spill]] }
 0xa92   : > { %p2594_p5 = scmp.ne.s32.totalorder %s3516_s21, 1 }
 0xa93   : > { %s3518_s9 = sld [smem:[#allocation12_spill]] (!%p2594_p5) }
 0xa94   : > { %s3519_s23 = sld [smem:[#allocation13_spill]] (!%p2594_p5) }
 0xa95   : > { %s3520_s21 = sld [smem:[#allocation20_spill]] (!%p2594_p5) }
 0xb02   : > { %v1889_v20 = vpop.xlane.xlu1 %1888 }
 0xb03   : > { %v1891_v21 = vmul.f32 0.03125, %v1889_v20 }
 0xb05   : > { %v1893_v24 = vadd.f32 1e-05, %v1891_v21 }
 0xb07   : > { %2866 = vrsqrt.f32 %v1893_v24 }
 0xb14   : > { %v2867_v31 = vpop.eup %2866 }
 0xb15   : > { %v1897_v32 = vmul.f32 %v2867_v31, %v1881_v13 }
 0xb17   : > { %v1905_v36 = vmul.f32 %v2580_v30, %v1897_v32 }
 0xb19   : > { %v1913_v28 = vadd.f32 %v2581_v35, %v1905_v36  ;;  %v2593_v36 = vld [vmem:[%s894_s14] ss:$0 sm:$0xff]  ;;  %s3517_s14 = sld [smem:[#allocation11_spill]] (!%p2594_p5) }
 0xb1b   : > { %v1914_v38 = vpack.c.bf16 %v1913_v28, %v1912_v37 }
 0xb1d   : > { %2777 = vmatmul.mubr.msk.bf16.vlgmr.msra.gmra.mxu1 %vm936_vm2, %v1914_v38 }
 0xbdd   : > { %v1975_v22 = vpop.f32.mrf.mxu1 }
 0xbde   : > { %v1976_v43 = vadd.f32 %v2582_v45, %v1975_v22 }
 0xbdf   : > { %v2778_v44 = vpop.f32.mrf.mxu1 }
 0xbe0   : > { %v1984_v26 = vmul.f32 0.044715, %v1976_v43  ;;  %v1982_v56 = vmul.f32 0.5, %v1976_v43 }
 0xbe1   : > { %v1978_v11 = vpop.f32.mrf.mxu1 }
 0xbe2   : > { %v1986_v33 = vmul.f32 %v1984_v26, %v1976_v43  ;;  %v1979_v46 = vadd.f32 %v2582_v45, %v1978_v11 }
 0xbe3   : > { %v2779_v47 = vpop.f32.mrf.mxu1 }
 0xbe4   : > { %v1988_v48 = vmul.f32 %v1986_v33, %v1976_v43  ;;  %v1985_v49 = vmul.f32 0.044715, %v1979_v46  ;;  %v1983_v23 = vmul.f32 0.5, %v1979_v46 }
 0xbe6   : > { %v1990_v51 = vadd.f32 %v1988_v48, %v1976_v43  ;;  %v1987_v50 = vmul.f32 %v1985_v49, %v1979_v46 }
 0xbe8   : > { %v1992_v5 = vmul.f32 0.7978846, %v1990_v51  ;;  %v1989_v3 = vmul.f32 %v1987_v50, %v1979_v46 }
 0xbea   : > { %2868 = vtanh.f32 %v1992_v5  ;;  %v1991_v52 = vadd.f32 %v1989_v3, %v1979_v46 }
 0xbec   : > { %v1993_v53 = vmul.f32 0.7978846, %v1991_v52 }
 0xbee   : > { %2870 = vtanh.f32 %v1993_v53 }
 0xbf7   : > { %v2869_v54 = vpop.eup %2868 }
 0xbf8   : > { %v1996_v25 = vadd.f32 1.0, %v2869_v54 }
 0xbfa   : > { %v1998_v58 = vmul.f32 %v1996_v25, %v1982_v56 }
 0xbfb   : > { %v2871_v55 = vpop.eup %2870 }
 0xbfc   : > { %v1997_v57 = vadd.f32 1.0, %v2871_v55 }
 0xbfe   : > { %v1999_v59 = vmul.f32 %v1997_v57, %v1983_v23 }
 0xc00   : > { %v2000_v60 = vpack.c.bf16 %v1999_v59, %v1998_v58 }
 0xc02   : > { %2789 = vmatmul.mubr.msk.bf16.vlgmr.msra.gmra.mxu0 %vm2040_vm7, %v2000_v60 }
 0xcc2   : > { %v2078_v62 = vpop.f32.mrf.mxu0 }
 0xcc3   : > { %v2079_v63 = vadd.f32 %v2586_v61, %v2078_v62 }
 0xcc4   : > { %v2790_v0 = vpop.f32.mrf.mxu0 }
 0xcc5   : > { %v2085_v1 = vadd.f32 %v2079_v63, %v1912_v37 }
 0xcc6   : > { %v2081_v2 = vpop.f32.mrf.mxu0 }
 0xcc7   : > { %v2082_v4 = vadd.f32 %v2586_v61, %v2081_v2  ;;  %v2089_v7 = vsel %vm936_vm2, %v2085_v1, 0.0 }
 0xcc8   : > { %2090 = vadd.xlane.f32.xlu1 %v2089_v7  ;;  %v2791_v8 = vpop.f32.mrf.mxu0 }
 0xcc9   : > { %v2086_v9 = vadd.f32 %v2082_v4, %v1913_v28 }
 0xccb   : > { %v2092_v10 = vsel %vm936_vm2, %v2086_v9, 0.0 }
 0xccc   : > { %2093 = vadd.xlane.f32.xlu0 %v2092_v10 }
 0xd51   : > { %v2091_v12 = vpop.xlane.xlu1 %2090 }
 0xd52   : > { %v2095_v13 = vmul.f32 0.03125, %v2091_v12 }
 0xd54   : > { %v2097_v14 = vsub.f32 %v2085_v1, %v2095_v13 }
 0xd55   : > { %v2094_v15 = vpop.xlane.xlu0 %2093 }
 0xd56   : > { %v2096_v16 = vmul.f32 0.03125, %v2094_v15  ;;  %v2099_v17 = vmul.f32 %v2097_v14, %v2097_v14 }
 0xd58   : > { %v2098_v6 = vsub.f32 %v2086_v9, %v2096_v16  ;;  %v2101_v18 = vsel %vm936_vm2, %v2099_v17, 0.0 }
 0xd59   : > { %2102 = vadd.xlane.f32.xlu1 %v2101_v18 }
 0xd5a   : > { %v2100_v19 = vmul.f32 %v2098_v6, %v2098_v6 }
 0xd5c   : > { %v2104_v20 = vsel %vm936_vm2, %v2100_v19, 0.0 }
 0xd5d   : > { %2105 = vadd.xlane.f32.xlu1 %v2104_v20 }
 0xde2   : > { %v2103_v21 = vpop.xlane.xlu1 %2102 }
 0xde3   : > { %v2107_v24 = vmul.f32 0.03125, %v2103_v21 }
 0xde5   : > { %v2109_v27 = vadd.f32 1e-05, %v2107_v24 }
 0xde6   : > { %v2106_v29 = vpop.xlane.xlu1 %2105 }
 0xde7   : > { %2872 = vrsqrt.f32 %v2109_v27  ;;  %v2108_v30 = vmul.f32 0.03125, %v2106_v29 }
 0xde9   : > { %v2110_v31 = vadd.f32 1e-05, %v2108_v30 }
 0xdeb   : > { %2874 = vrsqrt.f32 %v2110_v31 }
 0xdf4   : > { %v2873_v32 = vpop.eup %2872 }
 0xdf5   : > { %v2113_v35 = vmul.f32 %v2873_v32, %v2097_v14 }
 0xdf7   : > { %v2121_v37 = vmul.f32 %v2592_v34, %v2113_v35 }
 0xdf8   : > { %v2875_v28 = vpop.eup %2874 }
 0xdf9   : > { %v2129_v38 = vadd.f32 %v2593_v36, %v2121_v37  ;;  %v2114_v39 = vmul.f32 %v2875_v28, %v2098_v6 }
 0xdfb   : > { %2131 = vst.msk [vmem:[#allocation2] sm:$0xff] %vm936_vm2, %v2129_v38  ;;  %2133 = vst.msk [vmem:[%s3127_s10] sm:$0xff] %vm936_vm2, %v2129_v38  ;;  %v2122_v40 = vmul.f32 %v2592_v34, %v2114_v39  ;;  %2138 = sbr.rel (%p2594_p5) target bundleno = 3817 (0xee9), region = 108 }
 0xdfd   : > { %v2130_v41 = vadd.f32 %v2593_v36, %v2122_v40 }
 0xdff   : > { %2132 = vst.msk [vmem:[#allocation2 + $0x8] sm:$0xff] %vm936_vm2, %v2130_v41  ;;  %2134 = vst.msk [vmem:[%s3127_s10 + $0x8] sm:$0xff] %vm936_vm2, %v2130_v41 }
 0xe00   : > { %v2876_v42 = vld [vmem:[%s3517_s14 + $0x18] sm:$0xff]   ;;  %v2927_v45 = vmov 0.0   ;;  %v2877_v22 = vld [vmem:[%s3518_s9 + $0x8] sm:$0xff]   ;;  %vm2928_vm8 = vmmov 0   ;;  %v2879_v44 = vld [vmem:[%s3518_s9] sm:$0xff]   ;;  %v2226_v26 = vsel %vm936_vm2, %v2129_v38, -inf  ;;  %v2139_v61 = vpack.c.bf16 %v2130_v41, %v2129_v38 }
 0xe01   : > { %2792 = vmatprep.subr.bf16.mxu0 %v2927_v45  ;;  %2804 = vmatprep.subr.bf16.mxu1 %v2927_v45  ;;  %v2181_v43 = vsel %vm936_vm2, %v2876_v42, 0  ;;  %v2878_v11 = vld [vmem:[%s3517_s14 + $0x10] sm:$0xff]   ;;  %v2227_v33 = vrot.slane %v2226_v26, 4  ;;  %v2233_v46 = vsel %vm936_vm2, %v2130_v41, -inf  ;;  %v2880_v54 = vld [vmem:[%s3517_s14 + $0x8] sm:$0xff]   ;;  %vm2240_vm9 = vcmask 1040384  }
 0xe02   : > { %2808 = vmatprep.mubr.msk.bf16.mxu1 %vm2928_vm8, %v2927_v45  ;;  %2800 = vmatprep.mubr.msk.bf16.mxu0 %vm2928_vm8, %v2927_v45  ;;  %v2234_v47 = vrot.slane %v2233_v46, 4  ;;  %v2178_v51 = vsel %vm936_vm2, %v2878_v11, 0  ;;  %v2175_v23 = vsel %vm936_vm2, %v2880_v54, 0  ;;  %v2881_v59 = vld [vmem:[%s3517_s14] sm:$0xff]   ;;  %vm2310_vm10 = vcmask 17408  }
 0xe03   : > { %2793 = vmatpush3.bf16.xpose.msra.mxu0 %v2181_v43  ;;  %2805 = vmatpush3.bf16.msra.mxu1 %v2877_v22  ;;  %v2228_v48 = vmax.f32 %v2226_v26, %v2227_v33  ;;  %v2172_v60 = vsel %vm936_vm2, %v2881_v59, 0  ;;  %v2600_v62 = vld [vmem:[%s3519_s23] ss:$0 sm:$0xff] }
 0xe04   : > { %2794 = vmatprep.subr.bf16.mxu0 %v2927_v45  ;;  %2806 = vmatprep.subr.bf16.mxu1 %v2927_v45  ;;  %v2235_v49 = vmax.f32 %v2233_v46, %v2234_v47 }
 0xe05   : > { %v2229_v50 = vrot.slane %v2228_v48, 2 }
 0xe06   : > { %v2236_v5 = vrot.slane %v2235_v49, 2 }
 0xe07   : > { %2807 = vmatpush3.bf16.msra.mxu1 %v2879_v44  ;;  %v2230_v3 = vmax.f32 %v2228_v48, %v2229_v50 }
 0xe08   : > { %v2237_v52 = vmax.f32 %v2235_v49, %v2236_v5 }
 0xe09   : > { %v2231_v53 = vrot.slane %v2230_v3, 1 }
 0xe0a   : > { %v2238_v25 = vrot.slane %v2237_v52, 1 }
 0xe0b   : > { %2795 = vmatpush3.bf16.xpose.msra.mxu0 %v2178_v51  ;;  %v2232_v55 = vmax.f32 %v2230_v3, %v2231_v53 }
 0xe0c   : > { %2796 = vmatprep.subr.bf16.mxu0 %v2927_v45  ;;  %v2239_v56 = vmax.f32 %v2237_v52, %v2238_v25 }
 0xe0e   : > { %v2241_v57 = vsel %vm2240_vm9, %v2232_v55, %v2239_v56 }
 0xe0f   : > { %v2242_v58 = vpack.c.bf16 %v2241_v57, %v2241_v57 }
 0xe11   : > { %2809 = vmatmul.mubr.msk.bf16.vlgmr.msra.gmra.mxu1 %vm936_vm2, %v2242_v58 }
 0xe13   : > { %2797 = vmatpush3.bf16.xpose.msra.mxu0 %v2175_v23 }
 0xe14   : > { %2798 = vmatprep.subr.bf16.mxu0 %v2927_v45 }
 0xe1b   : > { %2799 = vmatpush3.bf16.xpose.msra.mxu0 %v2172_v60 }
 0xe22   : > { %2801 = vmatmul.mubr.msk.bf16.vlgmr.msra.gmra.mxu0 %vm936_vm2, %v2139_v61 }
 0xed1   : > { %v2303_v63 = vpop.f32.mrf.mxu1 }
 0xed2   : > { %v2304_v0 = vadd.f32 %v2600_v62, %v2303_v63 }
 0xed3   : > { %v2810_v1 = vpop.f32.mrf.mxu1 }
 0xed4   : > { %2882 = vtanh.f32 %v2304_v0 }
 0xed5   : > { %v2306_v2 = vpop.f32.mrf.mxu1 }
 0xed7   : > { %v2811_v4 = vpop.f32.mrf.mxu1 }
 0xee1   : > { %v2883_v8 = vpop.eup %2882 }
 0xee2   : > { %v2217_v7 = vpop.f32.mrf.mxu0  ;;  %2311 = vst.msk [vmem:[#allocation3] sm:$0x3] %vm2310_vm10, %v2883_v8 }
 0xee3   : > { %2224 = vst.msk [vmem:[%s3520_s21] sm:$0xff] %vm2040_vm7, %v2217_v7 }
 0xee4   : > { %v2802_v9 = vpop.f32.mrf.mxu0 }
 0xee6   : > { %v2220_v10 = vpop.f32.mrf.mxu0 }
 0xee7   : > { %2225 = vst.msk [vmem:[%s3520_s21 + $0x8] sm:$0xff] %vm2040_vm7, %v2220_v10 }
 0xee8   : > { %v2803_v12 = vpop.f32.mrf.mxu0 }
 0xee9 PF: > { %s3521_s26 = sld [smem:[#allocation7_spill]]  ;;  %s2929_s2 = smov [#allocation3]  }
 0xeea   : > { %s2330_s10 = sshll.u32 %s2929_s2, 4  ;;  %s2331_s10 = int_to_ptr.vmem [resolvable:$true] %s2330_s10 }
 0xeeb   : > { %s2884_s30 = scalar_lea.vmem %s2331_s10, 32  ;;  %p2891_p10 = scmp.lt.s32.totalorder %s2331_s10, %s2331_s10 }
 0xeec   : > { %p2885_p7 = scmp.ne.s32.totalorder %s2331_s10, %s2884_s30  ;;  %p2892_p11 = scmp.lt.s32.totalorder %s2884_s30, %s2884_s30 }
 0xeee   : > { %p2893_p12 = por %p2892_p11, %p2891_p10 }
 0xeef   : > { %p2816_p6 = scmp.eq.s32.totalorder %s3521_s26, 1 }
 0xef1   : > { %p2886_p8 = pnand %p2885_p7, %p2816_p6 }
 0xef3   : > { %p2887_p9 = pneg %p2886_p8 }
 0xef5   : > { %p2894_p13 = pnand %p2893_p12, %p2887_p9 }
 0xef7   : > { %2897 = shalt.err (!%p2894_p13)
}
 0xef8   : > { %s3522_s25 = sld [smem:[#allocation21_spill]] }
 0xefe   : > { %2813 = dma.vmem_to_hbm [thread:$0]  (%p2816_p6), %s2331_s10, 32, %s3522_s25, [#allocation4]  }
 0xeff   : > { %2913 = dma.done.wait (%p2816_p6), [#allocation4], 32  }
 0xf00   : > { %2915 = vsyncadd (%p2816_p6), [#allocation4], 4294967264 }
 0xf01 PF: > { %s3523_s4 = sld [smem:[#allocation6_spill]] }
 0xf07   : > { %s34_s3 = sadd.s32 1, %s3523_s4  }
 0xf08   : > { %p31_p0 = scmp.ge.s32.totalorder %s34_s3, 4  }
 0xf0a   :  { %33 = sbr.rel (!%p31_p0) target bundleno = 15 (0xf), region = 197 }
 0xf0f   :  { %2354 = vsyncpa [#allocation4], 1 }
 0xf10   :  { %2356 = vsyncpa [#allocation4 + $0x1], 1 }

</bundles_post_ra>
